<compile_context>
chip_gen: v7x
topology: tpu7x:2x2x1
jax: 0.10.0
libtpu: 0.0.40
codegen_flags: <defaults>
</compile_context>

<pallas_src>
import jax
import jax.numpy as jnp
from jax import lax
from jax.experimental import pallas as pl
from jax.experimental.pallas import tpu as pltpu


# --------------------------------------------------------------------------
# Kernel A: fused  conv1(as matmul) + bias + ReLU + MaxPool2d(3, 1, 1)
#   grid = (B,), one sample per step.
#   p_ref : (1, 256, K)  im2col patches of one sample (row r = h*16 + w)
#   w_ref : (K, 32)      conv weight, rows ordered (c, kh, kw)
#   b_ref : (1, 32)
#   o_ref : (1, 256, 32) pooled activation (HWC order when flattened)
#   buf   : (288, 32)    VMEM scratch: 16-row zero halo + 256 rows + 16-row halo
# --------------------------------------------------------------------------
def _conv_pool_kernel(p_ref, w_ref, b_ref, o_ref, buf):
    M = o_ref.shape[1]           # 256 = 16*16 output pixels (fixed by Linear(8192,..))
    OC = o_ref.shape[2]          # 32 output channels

    y = jnp.dot(p_ref[0], w_ref[...], preferred_element_type=jnp.float32)
    y = jnp.maximum(y + b_ref[...], 0.0)                    # (256, 32), >= 0

    # Zero halos (valid pool padding since y >= 0), then write the interior.
    zeros_halo = jnp.zeros((16, OC), jnp.float32)
    buf[0:16, :] = zeros_halo
    buf[M + 16:M + 32, :] = zeros_halo
    buf[16:16 + M, :] = y

    # Row r = h*16 + w  ->  w = r & 15 (output width is fixed at 16).
    r_idx = lax.broadcasted_iota(jnp.int32, (M, OC), 0)
    w_idx = jnp.bitwise_and(r_idx, 15)

    # --- max over the W direction: rows r-1, r, r+1 (mask W edges) --------
    left = jnp.where(w_idx > 0, buf[15:15 + M, :], 0.0)
    right = jnp.where(w_idx < 15, buf[17:17 + M, :], 0.0)
    m_w = jnp.maximum(y, jnp.maximum(left, right))

    # --- max over the H direction: rows r-16, r, r+16 (halo rows are 0) ---
    buf[16:16 + M, :] = m_w
    up = buf[0:M, :]             # m_w shifted by -16 rows
    down = buf[32:32 + M, :]     # m_w shifted by +16 rows
    o_ref[0] = jnp.maximum(m_w, jnp.maximum(up, down))


def conv_relu_pool(patches, wc, bc):
    B, M, K = patches.shape
    OC = wc.shape[1]
    return pl.pallas_call(
        _conv_pool_kernel,
        out_shape=jax.ShapeDtypeStruct((B, M, OC), jnp.float32),
        grid=(B,),
        in_specs=[
            pl.BlockSpec((1, M, K), lambda b: (b, 0, 0)),
            pl.BlockSpec((K, OC), lambda b: (0, 0)),
            pl.BlockSpec((1, OC), lambda b: (0, 0)),
        ],
        out_specs=pl.BlockSpec((1, M, OC), lambda b: (b, 0, 0)),
        scratch_shapes=[pltpu.VMEM((M + 32, OC), jnp.float32)],
        compiler_params=pltpu.CompilerParams(
            dimension_semantics=("parallel",)),
    )(patches, wc, bc)


# --------------------------------------------------------------------------
# Kernel B: fused MLP head  relu(x @ W1 + b1) @ W2 + b2
#   grid = (M tiles, K tiles); K is the 8192-wide reduction, tiled & pipelined.
# --------------------------------------------------------------------------
def _mlp_kernel(x_ref, w1_ref, b1_ref, w2_ref, b2_ref, o_ref, acc_ref):
    k = pl.program_id(1)

    @pl.when(k == 0)
    def _():
        acc_ref[...] = jnp.zeros_like(acc_ref)

    # bf16 MXU operands, f32 accumulation.
    acc_ref[...] += jnp.dot(x_ref[...].astype(jnp.bfloat16), w1_ref[...],
                            preferred_element_type=jnp.float32)

    @pl.when(k == pl.num_programs(1) - 1)
    def _():
        h = jnp.maximum(acc_ref[...] + b1_ref[...], 0.0)     # f32 epilogue
        o_ref[...] = (jnp.dot(h, w2_ref[...],
                              preferred_element_type=jnp.float32) + b2_ref[...])


def mlp_head(flat, w1_t, b1, w2_t, b2, *, block_k=2048):
    B, K = flat.shape
    H = w1_t.shape[1]
    N = w2_t.shape[1]
    bm = B if B <= 128 else 128           # block row-dim: full B (small) or 128
    block_k = min(block_k, K)
    grid = (pl.cdiv(B, bm), pl.cdiv(K, block_k))
    return pl.pallas_call(
        _mlp_kernel,
        out_shape=jax.ShapeDtypeStruct((B, N), jnp.float32),
        grid=grid,
        in_specs=[
            pl.BlockSpec((bm, block_k), lambda m, k: (m, k)),
            pl.BlockSpec((block_k, H), lambda m, k: (k, 0)),
            pl.BlockSpec((1, H), lambda m, k: (0, 0)),
            pl.BlockSpec((H, N), lambda m, k: (0, 0)),
            pl.BlockSpec((1, N), lambda m, k: (0, 0)),
        ],
        out_specs=pl.BlockSpec((bm, N), lambda m, k: (m, 0)),
        scratch_shapes=[pltpu.VMEM((bm, H), jnp.float32)],
        compiler_params=pltpu.CompilerParams(
            dimension_semantics=("parallel", "arbitrary"),
            vmem_limit_bytes=32 * 1024 * 1024),
    )(flat, w1_t, b1, w2_t, b2)


# --------------------------------------------------------------------------
# XLA glue: im2col for conv1 (kernel 5, stride 2, pad 2, 32x32 -> 16x16)
# --------------------------------------------------------------------------
def im2col_conv1(x):
    B, C, H, W = x.shape                 # H = W = 32
    OH = OW = 16
    xpad = jnp.pad(x, ((0, 0), (0, 0), (2, 2), (2, 2)))
    cols = []
    for kh in range(5):
        for kw in range(5):
            cols.append(xpad[:, :, kh:kh + 2 * OH:2, kw:kw + 2 * OW:2])
    patches = jnp.stack(cols, axis=2)               # (B, C, 25, 16, 16)
    patches = patches.transpose(0, 3, 4, 1, 2)      # (B, 16, 16, C, 25)
    return patches.reshape(B, OH * OW, C * 25)      # rows ordered h*16 + w


# --------------------------------------------------------------------------
# One-time (outside jit) weight preparation: transposes, HWC column permute,
# bf16 cast of the large lin1 weight.
# --------------------------------------------------------------------------
def prepare_params(params):
    C = params["conv1_w"].shape[1]
    num_classes = params["lin2_w"].shape[0]
    wc = params["conv1_w"].reshape(32, C * 25).T                  # (C*25, 32) f32
    bc = params["conv1_b"].reshape(1, 32)
    # lin1 columns: CHW (PyTorch flatten) -> HWC (our activation layout).
    w1 = params["lin1_w"].reshape(128, 32, 16, 16)
    w1 = w1.transpose(0, 2, 3, 1).reshape(128, 32 * 16 * 16)
    w1_t = w1.T.astype(jnp.bfloat16)                              # (8192, 128) bf16
    b1 = params["lin1_b"].reshape(1, 128)
    w2_t = params["lin2_w"].T                                     # (128, NC) f32
    b2 = params["lin2_b"].reshape(1, num_classes)
    return {"wc": wc, "bc": bc, "w1_t": w1_t, "b1": b1, "w2_t": w2_t, "b2": b2}


# --------------------------------------------------------------------------
# Full forward: 2 fused Pallas kernels + im2col glue + one free reshape.
# --------------------------------------------------------------------------
@jax.jit
def model_forward(x, prep):
    B = x.shape[0]
    patches = im2col_conv1(x)                                     # (B, 256, C*25)
    pooled = conv_relu_pool(patches, prep["wc"], prep["bc"])      # (B, 256, 32)
    flat = pooled.reshape(B, 256 * 32)                            # HWC flatten, free
    return mlp_head(flat, prep["w1_t"], prep["b1"],
                    prep["w2_t"], prep["b2"])                     # (B, num_classes)


# --------------------------------------------------------------------------
# Deterministic parameter init (PyTorch-style uniform bounds)
# --------------------------------------------------------------------------
def init_params(key, num_channels, num_classes):
    ks = jax.random.split(key, 6)

    def uni(k, shape, fan_in):
        bound = 1.0 / jnp.sqrt(fan_in)
        return jax.random.uniform(k, shape, jnp.float32, -bound, bound)

    fan_c1 = num_channels * 5 * 5
    return {
        "conv1_w": uni(ks[0], (32, num_channels, 5, 5), fan_c1),
        "conv1_b": uni(ks[1], (32,), fan_c1),
        "lin1_w": uni(ks[2], (128, 8192), 8192),
        "lin1_b": uni(ks[3], (128,), 8192),
        "lin2_w": uni(ks[4], (num_classes, 128), 128),
        "lin2_b": uni(ks[5], (num_classes,), 128),
    }


# --------------------------------------------------------------------------
# Pure-JAX reference (mirrors the bf16 lin1 matmul operands of the kernel)
# --------------------------------------------------------------------------
def reference_forward(x, params):
    y = lax.conv_general_dilated(
        x, params["conv1_w"], window_strides=(2, 2),
        padding=((2, 2), (2, 2)),
        dimension_numbers=("NCHW", "OIHW", "NCHW"))
    y = jnp.maximum(y + params["conv1_b"].reshape(1, -1, 1, 1), 0.0)
    y = lax.reduce_window(y, -jnp.inf, lax.max,
                          window_dimensions=(1, 1, 3, 3),
                          window_strides=(1, 1, 1, 1),
                          padding=((0, 0), (0, 0), (1, 1), (1, 1)))
    flat = y.reshape(y.shape[0], -1)                              # CHW flatten
    h = jnp.dot(flat.astype(jnp.bfloat16),
                params["lin1_w"].T.astype(jnp.bfloat16),
                preferred_element_type=jnp.float32) + params["lin1_b"]
    h = jnp.maximum(h, 0.0)
    return (jnp.dot(h, params["lin2_w"].T,
                    preferred_element_type=jnp.float32) + params["lin2_b"])


if __name__ == "__main__":
    # 32x32 spatial is required by Linear(8192, 128): 32 * 16 * 16 = 8192.
    B, C, H, W = 2, 3, 32, 32
    num_classes = 10

    key = jax.random.PRNGKey(0)
    kx, kp = jax.random.split(key)
    x = jax.random.normal(kx, (B, C, H, W), dtype=jnp.float32)
    params = init_params(kp, C, num_classes)
    prep = prepare_params(params)            # one-time weight prep, outside jit

    out = jax.block_until_ready(model_forward(x, prep))
    ref = jax.block_until_ready(reference_forward(x, params))

    assert out.shape == (B, num_classes)
    assert jnp.allclose(out, ref, atol=2e-2, rtol=2e-2), "mismatch vs reference"

    print("KERNEL_OK")
</pallas_src>

<mosaic_0001>
module attributes {stable_mosaic.version = 11 : i64} {
  func.func @_conv_pool_kernel(%arg0: i32, %arg1: memref<1x256x75xf32, #tpu.memory_space<vmem>>, %arg2: memref<75x32xf32, #tpu.memory_space<vmem>>, %arg3: memref<1x32xf32, #tpu.memory_space<vmem>>, %arg4: memref<1x256x32xf32, #tpu.memory_space<vmem>>, %arg5: memref<288x32xf32, #tpu.memory_space<vmem>>) attributes {dimension_semantics = [#tpu.dimension_semantics<parallel>], iteration_bounds = array<i64: 2>, scalar_prefetch = 0 : i64, scratch_operands = 1 : i64, tpu.core_type = #tpu.core_type<tc>, window_params = [{transform_indices = @transform_0, window_bounds = array<i64: 1, 256, 75>}, {pipeline_mode = #tpu.pipeline_mode<synchronous>, transform_indices = @transform_1, window_bounds = array<i64: 75, 32>}, {pipeline_mode = #tpu.pipeline_mode<synchronous>, transform_indices = @transform_2, window_bounds = array<i64: 1, 32>}, {transform_indices = @transform_3, window_bounds = array<i64: 1, 256, 32>}]} {
    %c0 = arith.constant 0 : index
    %c0_0 = arith.constant 0 : index
    %c0_1 = arith.constant 0 : index
    %0 = vector.load %arg1[%c0, %c0_0, %c0_1] : memref<1x256x75xf32, #tpu.memory_space<vmem>>, vector<1x256x75xf32>
    %1 = vector.shape_cast %0 : vector<1x256x75xf32> to vector<256x75xf32>
    %c0_2 = arith.constant 0 : index
    %c0_3 = arith.constant 0 : index
    %2 = vector.load %arg2[%c0_2, %c0_3] : memref<75x32xf32, #tpu.memory_space<vmem>>, vector<75x32xf32>
    %cst = arith.constant dense<0.000000e+00> : vector<256x32xf32>
    %3 = tpu.matmul %1, %2, %cst {dimension_numbers = #tpu.dot_dimension_numbers<[1], [0], [0], [1], [0, 0, 1, 1], [], []>} : vector<256x75xf32>, vector<75x32xf32>, vector<256x32xf32> -> vector<256x32xf32>
    %c0_4 = arith.constant 0 : index
    %c0_5 = arith.constant 0 : index
    %4 = vector.load %arg3[%c0_4, %c0_5] : memref<1x32xf32, #tpu.memory_space<vmem>>, vector<1x32xf32>
    %5 = vector.broadcast %4 : vector<1x32xf32> to vector<256x32xf32>
    %6 = arith.addf %3, %5 : vector<256x32xf32>
    %cst_6 = arith.constant 0.000000e+00 : f32
    %7 = vector.broadcast %cst_6 : f32 to vector<256x32xf32>
    %8 = arith.maximumf %6, %7 : vector<256x32xf32>
    %cst_7 = arith.constant 0.000000e+00 : f32
    %9 = vector.broadcast %cst_7 : f32 to vector<16x32xf32>
    %c0_8 = arith.constant 0 : index
    %c0_9 = arith.constant 0 : index
    %10 = vector.load %arg5[%c0_8, %c0_9] : memref<288x32xf32, #tpu.memory_space<vmem>>, vector<16x32xf32>
    tpu.vector_store %arg5[%c0_8, %c0_9], %9 {strides = array<i32>} : memref<288x32xf32, #tpu.memory_space<vmem>>, vector<16x32xf32>,
    %c272 = arith.constant 272 : index
    %c0_10 = arith.constant 0 : index
    %11 = vector.load %arg5[%c272, %c0_10] : memref<288x32xf32, #tpu.memory_space<vmem>>, vector<16x32xf32>
    tpu.vector_store %arg5[%c272, %c0_10], %9 {strides = array<i32>} : memref<288x32xf32, #tpu.memory_space<vmem>>, vector<16x32xf32>,
    %c16 = arith.constant 16 : index
    %c0_11 = arith.constant 0 : index
    %12 = vector.load %arg5[%c16, %c0_11] : memref<288x32xf32, #tpu.memory_space<vmem>>, vector<256x32xf32>
    tpu.vector_store %arg5[%c16, %c0_11], %8 {strides = array<i32>} : memref<288x32xf32, #tpu.memory_space<vmem>>, vector<256x32xf32>,
    %13 = tpu.iota {dimensions = array<i32: 0>} : vector<256x32xi32>
    %c15_i32 = arith.constant 15 : i32
    %14 = vector.broadcast %c15_i32 : i32 to vector<256x32xi32>
    %15 = arith.andi %13, %14 : vector<256x32xi32>
    %c0_i32 = arith.constant 0 : i32
    %16 = vector.broadcast %c0_i32 : i32 to vector<256x32xi32>
    %17 = arith.cmpi sgt, %15, %16 : vector<256x32xi32>
    %c15 = arith.constant 15 : index
    %c0_12 = arith.constant 0 : index
    %18 = vector.load %arg5[%c15, %c0_12] : memref<288x32xf32, #tpu.memory_space<vmem>>, vector<256x32xf32>
    %cst_13 = arith.constant 0.000000e+00 : f32
    %19 = vector.broadcast %cst_13 : f32 to vector<256x32xf32>
    %20 = arith.select %17, %18, %19 : vector<256x32xi1>, vector<256x32xf32>
    %c15_i32_14 = arith.constant 15 : i32
    %21 = vector.broadcast %c15_i32_14 : i32 to vector<256x32xi32>
    %22 = arith.cmpi slt, %15, %21 : vector<256x32xi32>
    %c17 = arith.constant 17 : index
    %c0_15 = arith.constant 0 : index
    %23 = vector.load %arg5[%c17, %c0_15] : memref<288x32xf32, #tpu.memory_space<vmem>>, vector<256x32xf32>
    %cst_16 = arith.constant 0.000000e+00 : f32
    %24 = vector.broadcast %cst_16 : f32 to vector<256x32xf32>
    %25 = arith.select %22, %23, %24 : vector<256x32xi1>, vector<256x32xf32>
    %26 = arith.maximumf %20, %25 : vector<256x32xf32>
    %27 = arith.maximumf %8, %26 : vector<256x32xf32>
    %c16_17 = arith.constant 16 : index
    %c0_18 = arith.constant 0 : index
    %28 = vector.load %arg5[%c16_17, %c0_18] : memref<288x32xf32, #tpu.memory_space<vmem>>, vector<256x32xf32>
    tpu.vector_store %arg5[%c16_17, %c0_18], %27 {strides = array<i32>} : memref<288x32xf32, #tpu.memory_space<vmem>>, vector<256x32xf32>,
    %c0_19 = arith.constant 0 : index
    %c0_20 = arith.constant 0 : index
    %29 = vector.load %arg5[%c0_19, %c0_20] : memref<288x32xf32, #tpu.memory_space<vmem>>, vector<256x32xf32>
    %c32 = arith.constant 32 : index
    %c0_21 = arith.constant 0 : index
    %30 = vector.load %arg5[%c32, %c0_21] : memref<288x32xf32, #tpu.memory_space<vmem>>, vector<256x32xf32>
    %31 = arith.maximumf %29, %30 : vector<256x32xf32>
    %32 = arith.maximumf %27, %31 : vector<256x32xf32>
    %c0_22 = arith.constant 0 : index
    %c0_23 = arith.constant 0 : index
    %c0_24 = arith.constant 0 : index
    %33 = vector.load %arg4[%c0_22, %c0_23, %c0_24] : memref<1x256x32xf32, #tpu.memory_space<vmem>>, vector<1x256x32xf32>
    %34 = vector.shape_cast %33 : vector<1x256x32xf32> to vector<256x32xf32>
    %35 = vector.shape_cast %32 : vector<256x32xf32> to vector<1x256x32xf32>
    tpu.vector_store %arg4[%c0_22, %c0_23, %c0_24], %35 {strides = array<i32>} : memref<1x256x32xf32, #tpu.memory_space<vmem>>, vector<1x256x32xf32>,
    return
  }
  func.func @transform_0(%arg0: i32) -> (i32, i32, i32) {
    %c0_i32 = arith.constant 0 : i32
    %c0_i32_0 = arith.constant 0 : i32
    %c0_i32_1 = arith.constant 0 : i32
    return %arg0, %c0_i32, %c0_i32_0 : i32, i32, i32
  }
  func.func @transform_1(%arg0: i32) -> (i32, i32) {
    %c0_i32 = arith.constant 0 : i32
    %c0_i32_0 = arith.constant 0 : i32
    %c0_i32_1 = arith.constant 0 : i32
    return %c0_i32, %c0_i32_0 : i32, i32
  }
  func.func @transform_2(%arg0: i32) -> (i32, i32) {
    %c0_i32 = arith.constant 0 : i32
    %c0_i32_0 = arith.constant 0 : i32
    %c0_i32_1 = arith.constant 0 : i32
    return %c0_i32, %c0_i32_0 : i32, i32
  }
  func.func @transform_3(%arg0: i32) -> (i32, i32, i32) {
    %c0_i32 = arith.constant 0 : i32
    %c0_i32_0 = arith.constant 0 : i32
    %c0_i32_1 = arith.constant 0 : i32
    return %arg0, %c0_i32, %c0_i32_0 : i32, i32, i32
  }
}

module attributes {stable_mosaic.version = 11 : i64} {
  func.func @_mlp_kernel(%arg0: i32, %arg1: i32, %arg2: memref<2x2048xf32, #tpu.memory_space<vmem>>, %arg3: memref<2048x128xbf16, #tpu.memory_space<vmem>>, %arg4: memref<1x128xf32, #tpu.memory_space<vmem>>, %arg5: memref<128x10xf32, #tpu.memory_space<vmem>>, %arg6: memref<1x10xf32, #tpu.memory_space<vmem>>, %arg7: memref<2x10xf32, #tpu.memory_space<vmem>>, %arg8: memref<2x128xf32, #tpu.memory_space<vmem>>) attributes {dimension_semantics = [#tpu.dimension_semantics<parallel>, #tpu.dimension_semantics<arbitrary>], iteration_bounds = array<i64: 1, 4>, scalar_prefetch = 0 : i64, scratch_operands = 1 : i64, tpu.core_type = #tpu.core_type<tc>, window_params = [{transform_indices = @transform_0, window_bounds = array<i64: 2, 2048>}, {transform_indices = @transform_1, window_bounds = array<i64: 2048, 128>}, {pipeline_mode = #tpu.pipeline_mode<synchronous>, transform_indices = @transform_2, window_bounds = array<i64: 1, 128>}, {pipeline_mode = #tpu.pipeline_mode<synchronous>, transform_indices = @transform_3, window_bounds = array<i64: 128, 10>}, {pipeline_mode = #tpu.pipeline_mode<synchronous>, transform_indices = @transform_4, window_bounds = array<i64: 1, 10>}, {transform_indices = @transform_5, window_bounds = array<i64: 2, 10>}]} {
    %c0_i32 = arith.constant 0 : i32
    %0 = arith.cmpi eq, %arg1, %c0_i32 : i32
    %1 = arith.extui %0 : i1 to i32
    %c0_i32_0 = arith.constant 0 : i32
    %2 = arith.cmpi ne, %1, %c0_i32_0 : i32
    scf.if %2 {
      %cst_9 = arith.constant 0.000000e+00 : f32
      %13 = vector.broadcast %cst_9 : f32 to vector<2x128xf32>
      %c0_10 = arith.constant 0 : index
      %c0_11 = arith.constant 0 : index
      %14 = vector.load %arg8[%c0_10, %c0_11] : memref<2x128xf32, #tpu.memory_space<vmem>>, vector<2x128xf32>
      tpu.vector_store %arg8[%c0_10, %c0_11], %13 {strides = array<i32>} : memref<2x128xf32, #tpu.memory_space<vmem>>, vector<2x128xf32>,
    } else {
    }
    %c0 = arith.constant 0 : index
    %c0_1 = arith.constant 0 : index
    %3 = vector.load %arg8[%c0, %c0_1] : memref<2x128xf32, #tpu.memory_space<vmem>>, vector<2x128xf32>
    %c0_2 = arith.constant 0 : index
    %c0_3 = arith.constant 0 : index
    %4 = vector.load %arg2[%c0_2, %c0_3] : memref<2x2048xf32, #tpu.memory_space<vmem>>, vector<2x2048xf32>
    %5 = arith.truncf %4 : vector<2x2048xf32> to vector<2x2048xbf16>
    %c0_4 = arith.constant 0 : index
    %c0_5 = arith.constant 0 : index
    %6 = vector.load %arg3[%c0_4, %c0_5] : memref<2048x128xbf16, #tpu.memory_space<vmem>>, vector<2048x128xbf16>
    %cst = arith.constant dense<0.000000e+00> : vector<2x128xf32>
    %7 = tpu.matmul %5, %6, %cst {dimension_numbers = #tpu.dot_dimension_numbers<[1], [0], [0], [1], [0, 0, 1, 1], [], []>} : vector<2x2048xbf16>, vector<2048x128xbf16>, vector<2x128xf32> -> vector<2x128xf32>
    %8 = arith.addf %3, %7 : vector<2x128xf32>
    %c0_6 = arith.constant 0 : index
    %c0_7 = arith.constant 0 : index
    %9 = vector.load %arg8[%c0_6, %c0_7] : memref<2x128xf32, #tpu.memory_space<vmem>>, vector<2x128xf32>
    tpu.vector_store %arg8[%c0_6, %c0_7], %8 {strides = array<i32>} : memref<2x128xf32, #tpu.memory_space<vmem>>, vector<2x128xf32>,
    %c3_i32 = arith.constant 3 : i32
    %10 = arith.cmpi eq, %arg1, %c3_i32 : i32
    %11 = arith.extui %10 : i1 to i32
    %c0_i32_8 = arith.constant 0 : i32
    %12 = arith.cmpi ne, %11, %c0_i32_8 : i32
    scf.if %12 {
      %c0_9 = arith.constant 0 : index
      %c0_10 = arith.constant 0 : index
      %13 = vector.load %arg8[%c0_9, %c0_10] : memref<2x128xf32, #tpu.memory_space<vmem>>, vector<2x128xf32>
      %c0_11 = arith.constant 0 : index
      %c0_12 = arith.constant 0 : index
      %14 = vector.load %arg4[%c0_11, %c0_12] : memref<1x128xf32, #tpu.memory_space<vmem>>, vector<1x128xf32>
      %15 = vector.broadcast %14 : vector<1x128xf32> to vector<2x128xf32>
      %16 = arith.addf %13, %15 : vector<2x128xf32>
      %cst_13 = arith.constant 0.000000e+00 : f32
      %17 = vector.broadcast %cst_13 : f32 to vector<2x128xf32>
      %18 = arith.maximumf %16, %17 : vector<2x128xf32>
      %c0_14 = arith.constant 0 : index
      %c0_15 = arith.constant 0 : index
      %19 = vector.load %arg5[%c0_14, %c0_15] : memref<128x10xf32, #tpu.memory_space<vmem>>, vector<128x10xf32>
      %cst_16 = arith.constant dense<0.000000e+00> : vector<2x10xf32>
      %20 = tpu.matmul %18, %19, %cst_16 {dimension_numbers = #tpu.dot_dimension_numbers<[1], [0], [0], [1], [0, 0, 1, 1], [], []>} : vector<2x128xf32>, vector<128x10xf32>, vector<2x10xf32> -> vector<2x10xf32>
      %c0_17 = arith.constant 0 : index
      %c0_18 = arith.constant 0 : index
      %21 = vector.load %arg6[%c0_17, %c0_18] : memref<1x10xf32, #tpu.memory_space<vmem>>, vector<1x10xf32>
      %22 = vector.broadcast %21 : vector<1x10xf32> to vector<2x10xf32>
      %23 = arith.addf %20, %22 : vector<2x10xf32>
      %c0_19 = arith.constant 0 : index
      %c0_20 = arith.constant 0 : index
      %24 = vector.load %arg7[%c0_19, %c0_20] : memref<2x10xf32, #tpu.memory_space<vmem>>, vector<2x10xf32>
      tpu.vector_store %arg7[%c0_19, %c0_20], %23 {strides = array<i32>} : memref<2x10xf32, #tpu.memory_space<vmem>>, vector<2x10xf32>,
    } else {
    }
    return
  }
  func.func @transform_0(%arg0: i32, %arg1: i32) -> (i32, i32) {
    %c0_i32 = arith.constant 0 : i32
    return %arg0, %arg1 : i32, i32
  }
  func.func @transform_1(%arg0: i32, %arg1: i32) -> (i32, i32) {
    %c0_i32 = arith.constant 0 : i32
    %c0_i32_0 = arith.constant 0 : i32
    return %arg1, %c0_i32 : i32, i32
  }
  func.func @transform_2(%arg0: i32, %arg1: i32) -> (i32, i32) {
    %c0_i32 = arith.constant 0 : i32
    %c0_i32_0 = arith.constant 0 : i32
    %c0_i32_1 = arith.constant 0 : i32
    return %c0_i32, %c0_i32_0 : i32, i32
  }
  func.func @transform_3(%arg0: i32, %arg1: i32) -> (i32, i32) {
    %c0_i32 = arith.constant 0 : i32
    %c0_i32_0 = arith.constant 0 : i32
    %c0_i32_1 = arith.constant 0 : i32
    return %c0_i32, %c0_i32_0 : i32, i32
  }
  func.func @transform_4(%arg0: i32, %arg1: i32) -> (i32, i32) {
    %c0_i32 = arith.constant 0 : i32
    %c0_i32_0 = arith.constant 0 : i32
    %c0_i32_1 = arith.constant 0 : i32
    return %c0_i32, %c0_i32_0 : i32, i32
  }
  func.func @transform_5(%arg0: i32, %arg1: i32) -> (i32, i32) {
    %c0_i32 = arith.constant 0 : i32
    %c0_i32_0 = arith.constant 0 : i32
    return %arg0, %c0_i32 : i32, i32
  }
}

</mosaic_0001>

<bundles_post_ra>
// kernel: model_forward.2
= control target key start
LH: loop header
LB: loop body
LE: loop exit
PB: predicated region body
PF: predicated region fallthrough
CT: control target
= control target key end

     0   :  { %s1384_s12 = smov 0   ;;  %s2475_s0 = inlined_call_operand.vmem [shape: f32[2,256,75], index: 0, kind: input, shape index: {}]   ;;  %s2476_s1 = inlined_call_operand.vmem [shape: f32[75,32], index: 1, kind: input, shape index: {}]   ;;  %s2477_s2 = inlined_call_operand.vmem [shape: f32[1,32], index: 2, kind: input, shape index: {}]   ;;  %s2478_s3 = inlined_call_operand.vmem [shape: f32[2,256,32], index: 3, kind: output, shape index: {}]  }
   0x1 LB: > { %s1155_s13 = sadd.s32 4294967295, %s1360_s12   ;;  %p1159_p0 = scmp.ge.s32.totalorder %s1360_s12, 1  ;;  %s1360_s12 = sphi %s1384_s12, %s13_s12  }
   0x2   : > { %p137_p1 = scmp.lt.s32.totalorder %s1360_s12, 3 }
   0x4   : > { %p138_p2 = pnand %p1159_p0, %p137_p1 }
   0x6   : > { %141 = sbr.rel (%p138_p2) target bundleno = 336 (0x150), region = 32 }
   0xd   : > { %v203_v0 = vld [vmem:[%s2476_s1] sm:$0xff]  ;;  %v204_v1 = vld [vmem:[%s2476_s1 + $0x8] sm:$0xff]  ;;  %v205_v2 = vld [vmem:[%s2476_s1 + $0x10] sm:$0xff]  ;;  %p161_p3 = scmp.lt.s32.totalorder %s1155_s13, 1  ;;  %vm220_vm0 = vcmask 613376   ;;  %vm317_vm1 = vcmask 1042432   ;;  %v615_v48 = vlaneseq }
   0xe   : > { %v1312_v3 = vpack.c.bf16 %v204_v1, %v203_v0  ;;  %v206_v4 = vld [vmem:[%s2476_s1 + $0x18] sm:$0xff]  ;;  %v207_v6 = vld [vmem:[%s2476_s1 + $0x20] sm:$0xff]  ;;  %v208_v7 = vld [vmem:[%s2476_s1 + $0x28] sm:$0xff]  ;;  %vm1362_vm2 = vmmov 1   ;;  %vm578_vm4 = vcmask 261120   ;;  %v1363_v47 = vmov 0.0  }
   0xf   : > { %v1316_v5 = vpack.c.bf16 %v206_v4, %v205_v2  ;;  %s2636_s13 = smov (!%p161_p3, %s1155_s13), 1  ;;  %v1320_v8 = vpack.c.bf16 %v208_v7, %v207_v6  ;;  %v209_v9 = vld [vmem:[%s2476_s1 + $0x30] sm:$0xff]  ;;  %v210_v10 = vld [vmem:[%s2476_s1 + $0x38] sm:$0xff]  ;;  %v211_v14 = vld [vmem:[%s2476_s1 + $0x40] sm:$0xff]  ;;  %579 = vst.msk [vmem:[#allocation2] sm:$0xff] %vm578_vm4, %v1363_v47  ;;  %v1500_v49 = vshrl.u32 %v615_v48, 7 }
  0x10   : > { %1313 = vmatprep.subr.bf16.mxu0 %v1312_v3  ;;  %1334 = vmatprep.subr.bf16.mxu1 %v1312_v3  ;;  %s1200_s26 = sshll.u32 %s2636_s13, 8  ;;  %v1324_v13 = vpack.c.bf16 %v210_v10, %v209_v9  ;;  %v212_v15 = vld [vmem:[%s2476_s1 + $0x48] sm:$0x7]  ;;  %vm1329_vm3 = vmpackc.low %vm317_vm1, %vm1362_vm2  ;;  %580 = vst.msk [vmem:[#allocation2 + $0x8] sm:$0xff] %vm578_vm4, %v1363_v47 }
  0x11   : > { %1315 = vmatpush3.bf16.msra.mxu0 %v1312_v3  ;;  %1339 = vmatpush3.bf16.msra.mxu1 %v1312_v3  ;;  %s1421_s4 = scalar_lea.vmem %s2475_s0, %s1200_s26  ;;  %v1328_v16 = vpack.c.bf16 %v212_v15, %v211_v14  ;;  %582 = vst.msk [vmem:[#allocation2 + $0x118] sm:$0xff] %vm578_vm4, %v1363_v47  ;;  %581 = vst.msk [vmem:[#allocation2 + $0x110] sm:$0xff] %vm578_vm4, %v1363_v47  ;;  %v1503_v50 = vadd.s32 8, %v1500_v49  ;;  %v1506_v51 = vadd.s32 16, %v1500_v49  ;;  %v1509_v52 = vadd.s32 136, %v1500_v49  ;;  %s2039_s17 = scalar_lea.vmem %s2478_s3, %s1200_s26 }
  0x12   : > { %1317 = vmatprep.subr.bf16.mxu0 %v1316_v5  ;;  %1335 = vmatprep.subr.bf16.mxu1 %v1316_v5  ;;  %v171_v11 = vld [vmem:[%s1421_s4] sm:$0xff]  ;;  %v172_v17 = vld [vmem:[%s1421_s4 + $0x8] sm:$0xff]  ;;  %v173_v19 = vld [vmem:[%s1421_s4 + $0x10] sm:$0xff]  ;;  %v1512_v53 = vadd.s32 144, %v1500_v49  ;;  %v648_v54 = vand.u32 15, %v1500_v49  ;;  %v1516_v55 = vadd.s32 24, %v1500_v49 }
  0x13   : > { %v187_v12 = vld [vmem:[%s1421_s4 + $0x80] sm:$0xff]  ;;  %1264 = vmatprep.mubr.msk.f32.mxu0 %vm220_vm0, %v171_v11  ;;  %v188_v18 = vld [vmem:[%s1421_s4 + $0x88] sm:$0xff]  ;;  %v189_v20 = vld [vmem:[%s1421_s4 + $0x90] sm:$0xff]  ;;  %v1519_v56 = vadd.s32 32, %v1500_v49  ;;  %v1522_v57 = vadd.s32 152, %v1500_v49  ;;  %v1525_v58 = vadd.s32 160, %v1500_v49 }
  0x14   : > { %1288 = vmatprep.mubr.msk.f32.mxu1 %vm220_vm0, %v187_v12  ;;  %v174_v21 = vld [vmem:[%s1421_s4 + $0x18] sm:$0xff]  ;;  %v175_v23 = vld [vmem:[%s1421_s4 + $0x20] sm:$0xff]  ;;  %v176_v25 = vld [vmem:[%s1421_s4 + $0x28] sm:$0xff]  ;;  %v1528_v59 = vadd.s32 40, %v1500_v49  ;;  %v1531_v60 = vadd.s32 48, %v1500_v49  ;;  %v1534_v61 = vadd.s32 168, %v1500_v49 }
  0x15   : > { %1319 = vmatpush3.bf16.msra.mxu0 %v1316_v5  ;;  %1340 = vmatpush3.bf16.msra.mxu1 %v1316_v5  ;;  %v190_v22 = vld [vmem:[%s1421_s4 + $0x98] sm:$0xff]  ;;  %v191_v24 = vld [vmem:[%s1421_s4 + $0xa0] sm:$0xff]  ;;  %v192_v26 = vld [vmem:[%s1421_s4 + $0xa8] sm:$0xff]  ;;  %v1537_v62 = vadd.s32 176, %v1500_v49  ;;  %v1540_v63 = vadd.s32 56, %v1500_v49  ;;  %v1543_v0 = vadd.s32 64, %v1500_v49 }
  0x16   : > { %1321 = vmatprep.subr.bf16.mxu0 %v1320_v8  ;;  %1336 = vmatprep.subr.bf16.mxu1 %v1320_v8  ;;  %v177_v27 = vld [vmem:[%s1421_s4 + $0x30] sm:$0xff]  ;;  %v178_v29 = vld [vmem:[%s1421_s4 + $0x38] sm:$0xff]  ;;  %v179_v31 = vld [vmem:[%s1421_s4 + $0x40] sm:$0xff]  ;;  %v649_v1 = vand.u32 15, %v1503_v50  ;;  %v650_v2 = vand.u32 15, %v1506_v51  ;;  %v665_v3 = vand.u32 15, %v1509_v52 }
  0x17   : > { %v193_v28 = vld [vmem:[%s1421_s4 + $0xb0] sm:$0xff]  ;;  %v194_v30 = vld [vmem:[%s1421_s4 + $0xb8] sm:$0xff]  ;;  %v195_v32 = vld [vmem:[%s1421_s4 + $0xc0] sm:$0xff]  ;;  %v666_v4 = vand.u32 15, %v1512_v53  ;;  %v651_v6 = vand.u32 15, %v1516_v55  ;;  %v652_v7 = vand.u32 15, %v1519_v56 }
  0x18   : > { %v180_v33 = vld [vmem:[%s1421_s4 + $0x48] sm:$0xff]  ;;  %v181_v35 = vld [vmem:[%s1421_s4 + $0x50] sm:$0xff]  ;;  %v182_v37 = vld [vmem:[%s1421_s4 + $0x58] sm:$0xff]  ;;  %v1560_v9 = vadd.s32 192, %v1500_v49  ;;  %v667_v10 = vand.u32 15, %v1522_v57  ;;  %v668_v11 = vand.u32 15, %v1525_v58 }
  0x19   : > { %1323 = vmatpush3.bf16.msra.mxu0 %v1320_v8  ;;  %1341 = vmatpush3.bf16.msra.mxu1 %v1320_v8  ;;  %v196_v34 = vld [vmem:[%s1421_s4 + $0xc8] sm:$0xff]  ;;  %v197_v36 = vld [vmem:[%s1421_s4 + $0xd0] sm:$0xff]  ;;  %v198_v38 = vld [vmem:[%s1421_s4 + $0xd8] sm:$0xff]  ;;  %v1557_v8 = vadd.s32 184, %v1500_v49  ;;  %v653_v12 = vand.u32 15, %v1528_v59  ;;  %vm1592_vm5 = vcmp.gt.s32.totalorder %v648_v54, 0 }
  0x1a   : > { %1325 = vmatprep.subr.bf16.mxu0 %v1324_v13  ;;  %1337 = vmatprep.subr.bf16.mxu1 %v1324_v13  ;;  %v183_v39 = vld [vmem:[%s1421_s4 + $0x60] sm:$0xff]  ;;  %v184_v41 = vld [vmem:[%s1421_s4 + $0x68] sm:$0xff]  ;;  %v185_v43 = vld [vmem:[%s1421_s4 + $0x70] sm:$0xff]  ;;  %v1637_v50 = vadd.s32 216, %v1500_v49  ;;  %v1640_v51 = vadd.s32 224, %v1500_v49  ;;  %vm1644_vm6 = vcmp.gt.s32.totalorder %v650_v2, 0 }
  0x1b   : > { %v199_v40 = vld [vmem:[%s1421_s4 + $0xe0] sm:$0xff]  ;;  %v200_v42 = vld [vmem:[%s1421_s4 + $0xe8] sm:$0xff]  ;;  %v201_v44 = vld [vmem:[%s1421_s4 + $0xf0] sm:$0xff]  ;;  %vm1648_vm7 = vcmp.lt.s32.totalorder %v649_v1, 15  ;;  %vm1656_vm8 = vcmp.gt.s32.totalorder %v666_v4, 0  ;;  %vm1670_vm9 = vcmp.lt.s32.totalorder %v665_v3, 15 }
  0x1c   : > { %v186_v45 = vld [vmem:[%s1421_s4 + $0x78] sm:$0xff]  ;;  %v1552_v5 = vld [vmem:[%s2477_s2] ss:$0 sm:$0xff]  ;;  %vm1704_vm10 = vcmp.gt.s32.totalorder %v652_v7, 0  ;;  %vm1710_vm11 = vcmp.lt.s32.totalorder %v651_v6, 15  ;;  %vm1724_vm12 = vcmp.gt.s32.totalorder %v668_v11, 0 }
  0x1d   : > { %1327 = vmatpush3.bf16.msra.mxu0 %v1324_v13  ;;  %1342 = vmatpush3.bf16.msra.mxu1 %v1324_v13  ;;  %v202_v46 = vld [vmem:[%s1421_s4 + $0xf8] sm:$0xff]  ;;  %v654_v13 = vand.u32 15, %v1531_v60  ;;  %vm1742_vm13 = vcmp.lt.s32.totalorder %v667_v10, 15  ;;  %vm1781_vm15 = vcmp.lt.s32.totalorder %v653_v12, 15 }
  0x1e   : > { %1330 = vmatprep.subr.msk.bf16.mxu0 %vm1329_vm3, %v1328_v16  ;;  %1338 = vmatprep.subr.msk.bf16.mxu1 %vm1329_vm3, %v1328_v16 }
  0x1f   : > { %vm1775_vm14 = vcmp.gt.s32.totalorder %v654_v13, 0 }
  0x21   : > { %1333 = vmatpush3.bf16.msk.msra.mxu0 %vm1329_vm3, %v1328_v16  ;;  %1343 = vmatpush3.bf16.msk.msra.mxu1 %vm1329_vm3, %v1328_v16 }
  0x24   : > { %1265 = vmatmul.mubr.msk.f32.vlgmr.msra.gmra.mrb[0].mxu0 %vm220_vm0, %v172_v17  ;;  %1289 = vmatmul.mubr.msk.f32.vlgmr.msra.gmra.mrb[0].mxu1 %vm220_vm0, %v188_v18  ;;  %v670_v17 = vand.u32 15, %v1537_v62  ;;  %v2536_v62 = vand.u32 15, %v1534_v61 }
  0x25   : > { %1267 = vmatprep.mubr.msk.f32.mxu0 %vm220_vm0, %v173_v19  ;;  %1291 = vmatprep.mubr.msk.f32.mxu1 %vm220_vm0, %v189_v20 }
  0x26   : > { %vm1808_vm1 = vcmp.lt.s32.totalorder %v2536_v62, 15 }
  0x28   : > { %1268 = vmatmul.mubr.msk.f32.gmra.mrb[2].mxu0 %vm220_vm0, %v174_v21  ;;  %1292 = vmatmul.mubr.msk.f32.gmra.mrb[2].mxu1 %vm220_vm0, %v190_v22 }
  0x29   : > { %1270 = vmatprep.mubr.msk.f32.mxu0 %vm220_vm0, %v175_v23  ;;  %1294 = vmatprep.mubr.msk.f32.mxu1 %vm220_vm0, %v191_v24  ;;  %v1577_v24 = vadd.s32 72, %v1500_v49 }
  0x2c   : > { %1271 = vmatmul.mubr.msk.f32.gmra.mrb[4].mxu0 %vm220_vm0, %v176_v25  ;;  %1295 = vmatmul.mubr.msk.f32.gmra.mrb[4].mxu1 %vm220_vm0, %v192_v26  ;;  %v1580_v25 = vadd.s32 80, %v1500_v49 }
  0x2d   : > { %1273 = vmatprep.mubr.msk.f32.mxu0 %vm220_vm0, %v177_v27  ;;  %1297 = vmatprep.mubr.msk.f32.mxu1 %vm220_vm0, %v193_v28  ;;  %v1732_v28 = vadd.s32 240, %v1500_v49 }
  0x2f   : > { %2527 = vst [vmem:[#allocation6_spill] sm:$0xff] %v1732_v28 }
  0x30   : > { %1274 = vmatmul.mubr.msk.f32.gmra.mrb[6].mxu0 %vm220_vm0, %v178_v29  ;;  %1298 = vmatmul.mubr.msk.f32.gmra.mrb[6].mxu1 %vm220_vm0, %v194_v30 }
  0x31   : > { %1276 = vmatprep.mubr.msk.f32.mxu0 %vm220_vm0, %v179_v31  ;;  %1300 = vmatprep.mubr.msk.f32.mxu1 %vm220_vm0, %v195_v32 }
  0x34   : > { %1277 = vmatmul.mubr.msk.f32.gmra.mrb[8].mxu0 %vm220_vm0, %v180_v33  ;;  %1301 = vmatmul.mubr.msk.f32.gmra.mrb[8].mxu1 %vm220_vm0, %v196_v34  ;;  %v1597_v33 = vadd.s32 200, %v1500_v49  ;;  %v1600_v34 = vadd.s32 208, %v1500_v49 }
  0x35   : > { %1279 = vmatprep.mubr.msk.f32.mxu0 %vm220_vm0, %v181_v35  ;;  %1303 = vmatprep.mubr.msk.f32.mxu1 %vm220_vm0, %v197_v36 }
  0x38   : > { %1280 = vmatmul.mubr.msk.f32.gmra.mrb[10].mxu0 %vm220_vm0, %v182_v37  ;;  %1304 = vmatmul.mubr.msk.f32.gmra.mrb[10].mxu1 %vm220_vm0, %v198_v38 }
  0x39   : > { %1282 = vmatprep.mubr.msk.f32.mxu0 %vm220_vm0, %v183_v39  ;;  %1306 = vmatprep.mubr.msk.f32.mxu1 %vm220_vm0, %v199_v40  ;;  %v1605_v39 = vadd.s32 88, %v1500_v49  ;;  %v1608_v40 = vadd.s32 96, %v1500_v49 }
  0x3c   : > { %1283 = vmatmul.mubr.msk.f32.gmra.mrb[12].mxu0 %vm220_vm0, %v184_v41  ;;  %1307 = vmatmul.mubr.msk.f32.gmra.mrb[12].mxu1 %vm220_vm0, %v200_v42 }
  0x3d   : > { %1285 = vmatprep.mubr.msk.f32.mxu0 %vm220_vm0, %v185_v43  ;;  %1309 = vmatprep.mubr.msk.f32.mxu1 %vm220_vm0, %v201_v44 }
  0x40   : > { %1286 = vmatmul.mubr.msk.f32.gmra.mrb[14].mxu0 %vm220_vm0, %v186_v45  ;;  %1310 = vmatmul.mubr.msk.f32.gmra.mrb[14].mxu1 %vm220_vm0, %v202_v46  ;;  %v1681_v45 = vadd.s32 120, %v1500_v49  ;;  %v1684_v46 = vadd.s32 128, %v1500_v49  ;;  %vm1790_vm0 = vcmp.gt.s32.totalorder %v670_v17, 0 }
  0xf7   : > { %v1266_v14 = vpop.f32.mrb[0].mxu0  ;;  %v1290_v15 = vpop.f32.mrb[0].mxu1 }
  0xf8   : > { %v1571_v20 = vadd.f32 %v1266_v14, %v1552_v5  ;;  %v1574_v21 = vadd.f32 %v1290_v15, %v1552_v5  ;;  %v387_v22 = vpop.f32.mrb[1].mxu0  ;;  %v467_v23 = vpop.f32.mrb[1].mxu1 }
  0xf9   : > { %v1583_v26 = vadd.f32 %v1552_v5, %v387_v22  ;;  %v1586_v27 = vadd.f32 %v1552_v5, %v467_v23 }
  0xfa   : > { %v2485_v30 = vmax.f32 %v1571_v20, 0.0  ;;  %v2482_v31 = vmax.f32 %v1574_v21, 0.0 }
  0xfb   : > { %2508 = vst [vmem:[#allocation3_spill] sm:$0xff] %v1586_v27  ;;  %v546_v35 = vmax.f32 %v1583_v26, 0.0  ;;  %v2479_v36 = vmax.f32 %v1586_v27, 0.0  ;;  %v1269_v37 = vpop.f32.mrb[2].mxu0  ;;  %v1293_v38 = vpop.f32.mrb[2].mxu1 }
  0xfc   : > { %584 = vst.msk [vmem:[#allocation2 + $0x18] sm:$0xff] %vm578_vm4, %v2485_v30  ;;  %600 = vst.msk [vmem:[#allocation2 + $0x98] sm:$0xff] %vm578_vm4, %v2482_v31  ;;  %v1617_v41 = vadd.f32 %v1269_v37, %v1552_v5  ;;  %v1620_v42 = vadd.f32 %v1293_v38, %v1552_v5  ;;  %v397_v43 = vpop.f32.mrb[3].mxu0  ;;  %v477_v44 = vpop.f32.mrb[3].mxu1  ;;  %v2556_v31 = vmax.f32 %v1574_v21, 0.0 }
  0xfd   : > { %583 = vst.msk [vmem:[#allocation2 + $0x10] sm:$0xff] %vm578_vm4, %v546_v35  ;;  %599 = vst.msk [vmem:[#allocation2 + $0x90] sm:$0xff] %vm578_vm4, %v2479_v36  ;;  %v1631_v47 = vadd.f32 %v1552_v5, %v397_v43  ;;  %v1634_v48 = vadd.f32 %v1552_v5, %v477_v44 }
  0xfe   : > { %v2481_v53 = vmax.f32 %v1617_v41, 0.0  ;;  %v2480_v54 = vmax.f32 %v1620_v42, 0.0 }
  0xff   : > { %v2484_v37 = vmax.f32 %v1631_v47, 0.0  ;;  %v2483_v38 = vmax.f32 %v1634_v48, 0.0  ;;  %v1272_v2 = vpop.f32.mrb[4].mxu0  ;;  %v1296_v44 = vpop.f32.mrb[4].mxu1 }
 0x100   : > { %586 = vst.msk [vmem:[#allocation2 + $0x28] sm:$0xff] %vm578_vm4, %v2481_v53  ;;  %602 = vst.msk [vmem:[#allocation2 + $0xa8] sm:$0xff] %vm578_vm4, %v2480_v54  ;;  %v1675_v22 = vadd.f32 %v1272_v2, %v1552_v5  ;;  %v1678_v36 = vadd.f32 %v1296_v44, %v1552_v5  ;;  %v407_v1 = vpop.f32.mrb[5].mxu0  ;;  %v487_v23 = vpop.f32.mrb[5].mxu1  ;;  %v1718_v2 = vadd.s32 112, %v1500_v49 }
 0x101   : > { %585 = vst.msk [vmem:[#allocation2 + $0x20] sm:$0xff] %vm578_vm4, %v2484_v37  ;;  %601 = vst.msk [vmem:[#allocation2 + $0xa0] sm:$0xff] %vm578_vm4, %v2483_v38  ;;  %v1693_v52 = vadd.f32 %v1552_v5, %v407_v1  ;;  %v1696_v3 = vadd.f32 %v1552_v5, %v487_v23  ;;  %v1715_v23 = vadd.s32 104, %v1500_v49  ;;  %v1729_v38 = vadd.s32 232, %v1500_v49 }
 0x102   : > { %v2486_v54 = vmax.f32 %v1675_v22, 0.0  ;;  %v2487_v53 = vmax.f32 %v1678_v36, 0.0 }
 0x103   : > { %2523 = vst [vmem:[#allocation4_spill] sm:$0xff] %v1715_v23  ;;  %v2491_v44 = vmax.f32 %v1693_v52, 0.0  ;;  %v2488_v56 = vmax.f32 %v1696_v3, 0.0  ;;  %v1275_v55 = vpop.f32.mrb[6].mxu0  ;;  %v1299_v6 = vpop.f32.mrb[6].mxu1  ;;  %2526 = vst [vmem:[#allocation5_spill] sm:$0xff] %v1729_v38 }
 0x104   : > { %v712_v29 = vld [vmem:[#allocation2 + $0xf] sm:$0xff]  ;;  %588 = vst.msk [vmem:[#allocation2 + $0x38] sm:$0xff] %vm578_vm4, %v2486_v54  ;;  %604 = vst.msk [vmem:[#allocation2 + $0xb8] sm:$0xff] %vm578_vm4, %v2487_v53  ;;  %v1747_v11 = vadd.f32 %v1275_v55, %v1552_v5  ;;  %v1750_v30 = vadd.f32 %v1299_v6, %v1552_v5  ;;  %v417_v18 = vpop.f32.mrb[7].mxu0  ;;  %v497_v19 = vpop.f32.mrb[7].mxu1  ;;  %v1769_v55 = vadd.s32 248, %v1500_v49 }
 0x105   : > { %v808_v37 = vld [vmem:[#allocation2 + $0x11] sm:$0xff]  ;;  %v744_v53 = vsel %vm1592_vm5, %v712_v29, 0.0  ;;  %587 = vst.msk [vmem:[#allocation2 + $0x30] sm:$0xff] %vm578_vm4, %v2491_v44  ;;  %603 = vst.msk [vmem:[#allocation2 + $0xb0] sm:$0xff] %vm578_vm4, %v2488_v56  ;;  %v1763_v57 = vadd.f32 %v1552_v5, %v417_v18  ;;  %v1766_v10 = vadd.f32 %v1552_v5, %v497_v19  ;;  %v2561_v54 = vmax.f32 %v1620_v42, 0.0  ;;  %v968_v42 = vld [vmem:[#allocation2] sm:$0xff] }
 0x106   : > { %v872_v6 = vmax.f32 %v744_v53, %v808_v37  ;;  %v2489_v29 = vmax.f32 %v1747_v11, 0.0  ;;  %v2490_v32 = vmax.f32 %v1750_v30, 0.0 }
 0x107   : > { %v2492_v19 = vmax.f32 %v1763_v57, 0.0  ;;  %v2493_v53 = vmax.f32 %v1766_v10, 0.0  ;;  %v1278_v13 = vpop.f32.mrb[8].mxu0  ;;  %v1302_v37 = vpop.f32.mrb[8].mxu1 }
 0x108   : > { %v1798_v16 = vmax.f32 %v546_v35, %v872_v6  ;;  %v714_v49 = vld [vmem:[#allocation2 + $0x1f] sm:$0xff]  ;;  %590 = vst.msk [vmem:[#allocation2 + $0x48] sm:$0xff] %vm578_vm4, %v2489_v29  ;;  %606 = vst.msk [vmem:[#allocation2 + $0xc8] sm:$0xff] %vm578_vm4, %v2490_v32  ;;  %v1813_v26 = vadd.f32 %v1278_v13, %v1552_v5  ;;  %v1816_v35 = vadd.f32 %v1302_v37, %v1552_v5  ;;  %v427_v6 = vpop.f32.mrb[9].mxu0  ;;  %v507_v12 = vpop.f32.mrb[9].mxu1  ;;  %v713_v29 = vld [vmem:[#allocation2 + $0x17] sm:$0xff] }
 0x109   : > { %v809_v56 = vld [vmem:[#allocation2 + $0x19] sm:$0xff]  ;;  %v746_v32 = vsel %vm1644_vm6, %v714_v49, 0.0  ;;  %v810_v44 = vld [vmem:[#allocation2 + $0x21] sm:$0xff]  ;;  %589 = vst.msk [vmem:[#allocation2 + $0x40] sm:$0xff] %vm578_vm4, %v2492_v19  ;;  %605 = vst.msk [vmem:[#allocation2 + $0xc0] sm:$0xff] %vm578_vm4, %v2493_v53  ;;  %v1830_v13 = vadd.f32 %v1552_v5, %v427_v6  ;;  %v1833_v37 = vadd.f32 %v1552_v5, %v507_v12  ;;  %v2539_v53 = vand.u32 15, %v1543_v0 }
 0x10a   : > { %v841_v61 = vsel %vm1648_vm7, %v809_v56, 0.0  ;;  %v730_v62 = vld [vmem:[#allocation2 + $0x9f] sm:$0xff]  ;;  %936 = vst.msk [vmem:[#allocation2 + $0x10] sm:$0xff] %vm578_vm4, %v1798_v16  ;;  %v874_v15 = vmax.f32 %v746_v32, %v810_v44  ;;  %v2542_v12 = vand.u32 15, %v1540_v63  ;;  %v729_v44 = vld [vmem:[#allocation2 + $0x97] sm:$0xff]  ;;  %v2498_v32 = vmax.f32 %v1816_v35, 0.0 }
 0x10b   : > { %v873_v14 = vmax.f32 %v713_v29, %v841_v61  ;;  %v762_v56 = vsel %vm1656_vm8, %v730_v62, 0.0  ;;  %v825_v49 = vld [vmem:[#allocation2 + $0x99] sm:$0xff]  ;;  %v826_v59 = vld [vmem:[#allocation2 + $0xa1] sm:$0xff]  ;;  %vm1842_vm2 = vcmp.gt.s32.totalorder %v2539_v53, 0  ;;  %v2500_v61 = vmax.f32 %v1830_v13, 0.0  ;;  %v1281_v0 = vpop.f32.mrb[10].mxu0 }
 0x10c   : > { %vm1848_vm3 = vcmp.lt.s32.totalorder %v2542_v12, 15  ;;  %v857_v43 = vsel %vm1670_vm9, %v825_v49, 0.0  ;;  %v890_v29 = vmax.f32 %v762_v56, %v826_v59  ;;  %v1305_v53 = vpop.f32.mrb[10].mxu1  ;;  %v2545_v62 = vmax.f32 %v1571_v20, 0.0  ;;  %v716_v28 = vld [vmem:[#allocation2 + $0x2f] sm:$0xff]  ;;  %608 = vst.msk [vmem:[#allocation2 + $0xd8] sm:$0xff] %vm578_vm4, %v2498_v32 }
 0x10d   : > { %v2546_v63 = vmax.f32 %v1631_v47, 0.0  ;;  %v889_v38 = vmax.f32 %v729_v44, %v857_v43  ;;  %v811_v23 = vld [vmem:[#allocation2 + $0x29] sm:$0xff]  ;;  %v2547_v4 = vmax.f32 %v1813_v26, 0.0  ;;  %v2499_v59 = vmax.f32 %v1833_v37, 0.0  ;;  %591 = vst.msk [vmem:[#allocation2 + $0x50] sm:$0xff] %vm578_vm4, %v2500_v61  ;;  %v717_v61 = vld [vmem:[#allocation2 + $0x37] sm:$0xff] }
 0x10e   : > { %v1858_v19 = vmax.f32 %v2545_v62, %v873_v14  ;;  %v2548_v56 = vand.u32 15, %v1560_v9  ;;  %v2551_v20 = vand.u32 15, %v1557_v8  ;;  %v437_v14 = vpop.f32.mrb[11].mxu0  ;;  %v715_v44 = vld [vmem:[#allocation2 + $0x27] sm:$0xff]  ;;  %v2554_v43 = vmax.f32 %v1634_v48, 0.0 }
 0x10f   : > { %v1862_v12 = vmax.f32 %v2546_v63, %v874_v15  ;;  %592 = vst.msk [vmem:[#allocation2 + $0x58] sm:$0xff] %vm578_vm4, %v2547_v4  ;;  %v517_v15 = vpop.f32.mrb[11].mxu1  ;;  %v748_v9 = vsel %vm1704_vm10, %v716_v28, 0.0  ;;  %v812_v63 = vld [vmem:[#allocation2 + $0x31] sm:$0xff]  ;;  %v843_v4 = vsel %vm1710_vm11, %v811_v23, 0.0  ;;  %v1895_v8 = vadd.f32 %v1281_v0, %v1552_v5  ;;  %v731_v28 = vld [vmem:[#allocation2 + $0xa7] sm:$0xff] }
 0x110   : > { %vm1870_vm5 = vcmp.gt.s32.totalorder %v2548_v56, 0  ;;  %vm1876_vm6 = vcmp.lt.s32.totalorder %v2551_v20, 15  ;;  %v1882_v62 = vmax.f32 %v2554_v43, %v890_v29  ;;  %v732_v56 = vld [vmem:[#allocation2 + $0xaf] sm:$0xff]  ;;  %937 = vst.msk [vmem:[#allocation2 + $0x18] sm:$0xff] %vm578_vm4, %v1858_v19  ;;  %v1903_v48 = vmax.f32 %v2556_v31, %v889_v38  ;;  %607 = vst.msk [vmem:[#allocation2 + $0xd0] sm:$0xff] %vm578_vm4, %v2499_v59 }
 0x111   : > { %938 = vst.msk [vmem:[#allocation2 + $0x20] sm:$0xff] %vm578_vm4, %v1862_v12  ;;  %v875_v1 = vmax.f32 %v715_v44, %v843_v4  ;;  %v876_v23 = vmax.f32 %v748_v9, %v812_v63  ;;  %v764_v29 = vsel %vm1724_vm12, %v732_v56, 0.0  ;;  %v827_v20 = vld [vmem:[#allocation2 + $0xa9] sm:$0xff]  ;;  %v828_v43 = vld [vmem:[#allocation2 + $0xb1] sm:$0xff]  ;;  %v1918_v7 = vadd.f32 %v1305_v53, %v1552_v5  ;;  %v1284_v9 = vpop.f32.mrb[12].mxu0  ;;  %v1920_v63 = vpop.f32.mrb[12].mxu1 }
 0x112   : > { %2555 = vst [vmem:[#allocation7_spill] sm:$0xff] %v1882_v62  ;;  %v1910_v0 = vld [vmem:[#allocation2 + $0x91] sm:$0xff]  ;;  %954 = vst.msk [vmem:[#allocation2 + $0xa0] sm:$0xff] %vm578_vm4, %v1882_v62  ;;  %v859_v21 = vsel %vm1742_vm13, %v827_v20, 0.0  ;;  %v892_v38 = vmax.f32 %v764_v29, %v828_v43  ;;  %v2557_v4 = vmax.f32 %v1617_v41, 0.0  ;;  %v2558_v31 = vmax.f32 %v1693_v52, 0.0 }
 0x113   : > { %953 = vst.msk [vmem:[#allocation2 + $0x98] sm:$0xff] %vm578_vm4, %v1903_v48  ;;  %v891_v29 = vmax.f32 %v731_v28, %v859_v21  ;;  %v718_v20 = vld [vmem:[#allocation2 + $0x3f] sm:$0xff]  ;;  %v1933_v53 = vadd.f32 %v1552_v5, %v437_v14  ;;  %v1935_v32 = vpop.f32.mrb[13].mxu0  ;;  %v1937_v59 = vpop.f32.mrb[13].mxu1  ;;  %v2559_v44 = vmax.f32 %v1696_v3, 0.0  ;;  %v2560_v14 = vmax.f32 %v1895_v8, 0.0 }
 0x114   : > { %v1926_v56 = vmax.f32 %v2557_v4, %v875_v1  ;;  %v1930_v58 = vmax.f32 %v2558_v31, %v876_v23  ;;  %v813_v43 = vld [vmem:[#allocation2 + $0x39] sm:$0xff]  ;;  %v750_v52 = vsel %vm1775_vm14, %v718_v20, 0.0  ;;  %v814_v1 = vld [vmem:[#allocation2 + $0x41] sm:$0xff]  ;;  %v2565_v21 = vand.u32 15, %v1577_v24 }
 0x115   : > { %v1941_v41 = vmax.f32 %v2559_v44, %v892_v38  ;;  %v845_v28 = vsel %vm1781_vm15, %v813_v43, 0.0  ;;  %v734_v23 = vld [vmem:[#allocation2 + $0xbf] sm:$0xff]  ;;  %594 = vst.msk [vmem:[#allocation2 + $0x68] sm:$0xff] %vm578_vm4, %v2560_v14  ;;  %v733_v3 = vld [vmem:[#allocation2 + $0xb7] sm:$0xff]  ;;  %v1957_v38 = vmax.f32 %v2561_v54, %v891_v29  ;;  %v878_v44 = vmax.f32 %v750_v52, %v814_v1  ;;  %v1287_v52 = vpop.f32.mrb[14].mxu0  ;;  %v1311_v1 = vpop.f32.mrb[14].mxu1 }
 0x116   : > { %939 = vst.msk [vmem:[#allocation2 + $0x28] sm:$0xff] %vm578_vm4, %v1926_v56  ;;  %940 = vst.msk [vmem:[#allocation2 + $0x30] sm:$0xff] %vm578_vm4, %v1930_v58  ;;  %v877_v18 = vmax.f32 %v717_v61, %v845_v28  ;;  %v766_v4 = vsel %vm1790_vm0, %v734_v23, 0.0  ;;  %v829_v31 = vld [vmem:[#allocation2 + $0xb9] sm:$0xff]  ;;  %v830_v20 = vld [vmem:[#allocation2 + $0xc1] sm:$0xff]  ;;  %v2562_v43 = vand.u32 15, %v1580_v25  ;;  %v1982_v24 = vadd.f32 %v1552_v5, %v517_v15 }
 0x117   : > { %vm1969_vm8 = vcmp.lt.s32.totalorder %v2565_v21, 15  ;;  %956 = vst.msk [vmem:[#allocation2 + $0xb0] sm:$0xff] %vm578_vm4, %v1941_v41  ;;  %v861_v60 = vsel %vm1808_vm1, %v829_v31, 0.0  ;;  %v894_v61 = vmax.f32 %v766_v4, %v830_v20  ;;  %v2568_v25 = vmax.f32 %v1918_v7, 0.0  ;;  %955 = vst.msk [vmem:[#allocation2 + $0xa8] sm:$0xff] %vm578_vm4, %v1957_v38  ;;  %v719_v28 = vld [vmem:[#allocation2 + $0x47] sm:$0xff] }
 0x118   : > { %vm1963_vm7 = vcmp.gt.s32.totalorder %v2562_v43, 0  ;;  %v2569_v23 = vmax.f32 %v1675_v22, 0.0  ;;  %v2570_v21 = vmax.f32 %v1763_v57, 0.0  ;;  %v893_v4 = vmax.f32 %v733_v3, %v861_v60  ;;  %v720_v31 = vld [vmem:[#allocation2 + $0x4f] sm:$0xff]  ;;  %v457_v57 = vpop.f32.mrb[15].mxu0  ;;  %v2011_v3 = vld [vmem:[#allocation2 + $0x20] sm:$0xff] }
 0x119   : > { %610 = vst.msk [vmem:[#allocation2 + $0xe8] sm:$0xff] %vm578_vm4, %v2568_v25  ;;  %v815_v20 = vld [vmem:[#allocation2 + $0x49] sm:$0xff]  ;;  %v2571_v15 = vand.u32 15, %v1600_v34  ;;  %v2574_v25 = vand.u32 15, %v1597_v33  ;;  %v2007_v22 = vadd.f32 %v1284_v9, %v1552_v5  ;;  %v2577_v34 = vmax.f32 %v1766_v10, 0.0  ;;  %v816_v60 = vld [vmem:[#allocation2 + $0x51] sm:$0xff] }
 0x11a   : > { %v1988_v17 = vmax.f32 %v2569_v23, %v877_v18  ;;  %v1992_v54 = vmax.f32 %v2570_v21, %v878_v44  ;;  %v2009_v18 = vpop.f32.mrb[15].mxu1  ;;  %v752_v33 = vsel %vm1842_vm2, %v720_v31, 0.0  ;;  %v847_v23 = vsel %vm1848_vm3, %v815_v20, 0.0  ;;  %v736_v21 = vld [vmem:[#allocation2 + $0xcf] sm:$0xff]  ;;  %v735_v10 = vld [vmem:[#allocation2 + $0xc7] sm:$0xff] }
 0x11b   : > { %vm1996_vm9 = vcmp.gt.s32.totalorder %v2571_v15, 0  ;;  %vm2002_vm10 = vcmp.lt.s32.totalorder %v2574_v25, 15  ;;  %v2015_v44 = vmax.f32 %v2577_v34, %v894_v61  ;;  %v2578_v9 = vmax.f32 %v1933_v53, 0.0  ;;  %v831_v20 = vld [vmem:[#allocation2 + $0xc9] sm:$0xff]  ;;  %v832_v34 = vld [vmem:[#allocation2 + $0xd1] sm:$0xff] }
 0x11c   : > { %v2505_v15 = vmax.f32 %v1982_v24, 0.0  ;;  %v1004_v25 = vmax.f32 %v968_v42, %v2011_v3  ;;  %941 = vst.msk [vmem:[#allocation2 + $0x38] sm:$0xff] %vm578_vm4, %v1988_v17  ;;  %942 = vst.msk [vmem:[#allocation2 + $0x40] sm:$0xff] %vm578_vm4, %v1992_v54  ;;  %v2579_v6 = vmax.f32 %v1678_v36, 0.0  ;;  %v879_v61 = vmax.f32 %v719_v28, %v847_v23 }
 0x11d   : > { %593 = vst.msk [vmem:[#allocation2 + $0x60] sm:$0xff] %vm578_vm4, %v2578_v9  ;;  %v880_v31 = vmax.f32 %v752_v33, %v816_v60  ;;  %958 = vst.msk [vmem:[#allocation2 + $0xc0] sm:$0xff] %vm578_vm4, %v2015_v44  ;;  %v768_v42 = vsel %vm1870_vm5, %v736_v21, 0.0  ;;  %v863_v36 = vsel %vm1876_vm6, %v831_v20, 0.0  ;;  %v2503_v28 = vmax.f32 %v2007_v22, 0.0  ;;  %v969_v9 = vld [vmem:[#allocation2 + $0x8] sm:$0xff] }
 0x11e   : > { %v2032_v27 = vmax.f32 %v2579_v6, %v893_v4  ;;  %609 = vst.msk [vmem:[#allocation2 + $0xe0] sm:$0xff] %vm578_vm4, %v2505_v15  ;;  %v2053_v4 = vadd.f32 %v1920_v63, %v1552_v5  ;;  %v1036_v33 = vmax.f32 %v1798_v16, %v1004_v25  ;;  %v2580_v49 = vmax.f32 %v1747_v11, 0.0  ;;  %v721_v6 = vld [vmem:[#allocation2 + $0x57] sm:$0xff] }
 0x11f   : > { %v2581_v60 = vmax.f32 %v1830_v13, 0.0  ;;  %v895_v21 = vmax.f32 %v735_v10, %v863_v36  ;;  %v896_v20 = vmax.f32 %v768_v42, %v832_v34  ;;  %596 = vst.msk [vmem:[#allocation2 + $0x78] sm:$0xff] %vm578_vm4, %v2503_v28  ;;  %v2072_v63 = vadd.f32 %v1552_v5, %v1935_v32  ;;  %v2078_v13 = vld [vmem:[#allocation2 + $0x28] sm:$0xff]  ;;  %v2080_v25 = vld [vmem:[#allocation2 + $0x30] sm:$0xff] }
 0x120   : > { %957 = vst.msk [vmem:[#allocation2 + $0xb8] sm:$0xff] %vm578_vm4, %v2032_v27  ;;  %v2060_v47 = vmax.f32 %v2580_v49, %v879_v61  ;;  %v2502_v16 = vmax.f32 %v2053_v4, 0.0  ;;  %v2076_v11 = vadd.f32 %v1552_v5, %v1937_v59  ;;  %1068 = vst.msk [vmem:[%s2039_s17] sm:$0xff] %vm578_vm4, %v1036_v33  ;;  %v2582_v10 = vmax.f32 %v1750_v30, 0.0 }
 0x121   : > { %v2064_v23 = vmax.f32 %v2581_v60, %v880_v31  ;;  %v2583_v61 = vand.u32 15, %v1608_v40  ;;  %v2586_v31 = vand.u32 15, %v1605_v39  ;;  %v2105_v42 = vadd.f32 %v1287_v52, %v1552_v5  ;;  %v737_v40 = vld [vmem:[#allocation2 + $0xd7] sm:$0xff] }
 0x122   : > { %943 = vst.msk [vmem:[#allocation2 + $0x48] sm:$0xff] %vm578_vm4, %v2060_v47  ;;  %v2090_v32 = vmax.f32 %v2582_v10, %v895_v21  ;;  %v2108_v36 = vadd.f32 %v1311_v1, %v1552_v5  ;;  %v2111_v30 = vadd.f32 %v1552_v5, %v457_v57  ;;  %v2589_v33 = vmax.f32 %v1833_v37, 0.0  ;;  %612 = vst.msk [vmem:[#allocation2 + $0xf8] sm:$0xff] %vm578_vm4, %v2502_v16  ;;  %v970_v57 = vld [vmem:[#allocation2 + $0x10] sm:$0xff] }
 0x123   : > { %944 = vst.msk [vmem:[#allocation2 + $0x50] sm:$0xff] %vm578_vm4, %v2064_v23  ;;  %vm2094_vm11 = vcmp.gt.s32.totalorder %v2583_v61, 0  ;;  %vm2100_vm12 = vcmp.lt.s32.totalorder %v2586_v31, 15  ;;  %v2504_v39 = vmax.f32 %v2072_v63, 0.0  ;;  %v2506_v52 = vmax.f32 %v2076_v11, 0.0  ;;  %v2159_v14 = vld [vmem:[#allocation2 + $0x38] sm:$0xff] }
 0x124   : > { %v2115_v49 = vmax.f32 %v2589_v33, %v896_v20  ;;  %v2590_v60 = vand.u32 15, %v1640_v51  ;;  %v1005_v21 = vmax.f32 %v969_v9, %v2078_v13  ;;  %959 = vst.msk [vmem:[#allocation2 + $0xc8] sm:$0xff] %vm578_vm4, %v2090_v32  ;;  %v722_v37 = vld [vmem:[#allocation2 + $0x5f] sm:$0xff]  ;;  %v2593_v10 = vand.u32 15, %v1637_v50 }
 0x125   : > { %v817_v20 = vld [vmem:[#allocation2 + $0x59] sm:$0xff]  ;;  %v561_v51 = vmax.f32 %v2105_v42, 0.0  ;;  %v2507_v31 = vmax.f32 %v2108_v36, 0.0  ;;  %v1006_v9 = vmax.f32 %v970_v57, %v2080_v25  ;;  %v754_v16 = vsel %vm1963_vm7, %v722_v37, 0.0  ;;  %v818_v50 = vld [vmem:[#allocation2 + $0x61] sm:$0xff]  ;;  %595 = vst.msk [vmem:[#allocation2 + $0x70] sm:$0xff] %vm578_vm4, %v2504_v39 }
 0x126   : > { %vm2124_vm13 = vcmp.gt.s32.totalorder %v2590_v60, 0  ;;  %vm2133_vm14 = vcmp.lt.s32.totalorder %v2593_v10, 15  ;;  %v971_v60 = vld [vmem:[#allocation2 + $0x18] sm:$0xff]  ;;  %960 = vst.msk [vmem:[#allocation2 + $0xd0] sm:$0xff] %vm578_vm4, %v2115_v49  ;;  %v849_v10 = vsel %vm1969_vm8, %v817_v20, 0.0  ;;  %611 = vst.msk [vmem:[#allocation2 + $0xf0] sm:$0xff] %vm578_vm4, %v2506_v52  ;;  %v1037_v62 = vmax.f32 %v1858_v19, %v1005_v21 }
 0x127   : > { %v2596_v57 = vand.u32 15, %v1684_v46  ;;  %v2161_v37 = vld [vmem:[#allocation2 + $0x40] sm:$0xff]  ;;  %v2166_v20 = vadd.f32 %v1552_v5, %v2009_v18  ;;  %v881_v39 = vmax.f32 %v721_v6, %v849_v10  ;;  %v882_v15 = vmax.f32 %v754_v16, %v818_v50  ;;  %598 = vst.msk [vmem:[#allocation2 + $0x88] sm:$0xff] %vm578_vm4, %v561_v51  ;;  %614 = vst.msk [vmem:[#allocation2 + $0x108] sm:$0xff] %vm578_vm4, %v2507_v31  ;;  %v2190_v10 = vld [vmem:[#allocation2 + $0xb8] sm:$0xff] }
 0x128   : > { %v738_v52 = vld [vmem:[#allocation2 + $0xdf] sm:$0xff]  ;;  %v2599_v46 = vmax.f32 %v2111_v30, 0.0  ;;  %v2600_v5 = vand.u32 15, %v1681_v45  ;;  %v1007_v18 = vmax.f32 %v971_v60, %v2159_v14  ;;  %v1008_v6 = vmax.f32 %v2011_v3, %v2161_v37  ;;  %1069 = vst.msk [vmem:[%s2039_s17 + $0x8] sm:$0xff] %vm578_vm4, %v1037_v62 }
 0x129   : > { %vm2155_vm15 = vcmp.gt.s32.totalorder %v2596_v57, 0  ;;  %v833_v33 = vld [vmem:[#allocation2 + $0xd9] sm:$0xff]  ;;  %v770_v16 = vsel %vm1996_vm9, %v738_v52, 0.0  ;;  %v834_v21 = vld [vmem:[#allocation2 + $0xe1] sm:$0xff]  ;;  %v1038_v45 = vmax.f32 %v1862_v12, %v1006_v9  ;;  %v576_v60 = vmax.f32 %v2166_v20, 0.0 }
 0x12a   : > { %597 = vst.msk [vmem:[#allocation2 + $0x80] sm:$0xff] %vm578_vm4, %v2599_v46  ;;  %vm2179_vm0 = vcmp.lt.s32.totalorder %v2600_v5, 15  ;;  %v865_v50 = vsel %vm2002_vm10, %v833_v33, 0.0  ;;  %v2192_v57 = vld [vmem:[#allocation2 + $0xc0] sm:$0xff]  ;;  %v2603_v3 = vmax.f32 %v1813_v26, 0.0  ;;  %v2604_v43 = vmax.f32 %v1933_v53, 0.0 }
 0x12b   : > { %v897_v29 = vmax.f32 %v737_v40, %v865_v50  ;;  %v898_v33 = vmax.f32 %v770_v16, %v834_v21  ;;  %v2206_v5 = vld [vmem:[#allocation2 + $0x98] sm:$0xff]  ;;  %v2208_v31 = vld [vmem:[#allocation2 + $0xa0] sm:$0xff]  ;;  %v2210_v9 = vld [vmem:[#allocation2 + $0x48] sm:$0xff]  ;;  %v1039_v53 = vmax.f32 %v1926_v56, %v1007_v18  ;;  %1070 = vst.msk [vmem:[%s2039_s17 + $0x10] sm:$0xff] %vm578_vm4, %v1038_v45  ;;  %v2605_v40 = vmax.f32 %v1816_v35, 0.0 }
 0x12c   : > { %v2200_v46 = vmax.f32 %v2603_v3, %v881_v39  ;;  %v2204_v52 = vmax.f32 %v2604_v43, %v882_v15  ;;  %v723_v12 = vld [vmem:[#allocation2 + $0x67] sm:$0xff]  ;;  %v2212_v62 = vld [vmem:[#allocation2 + $0x50] sm:$0xff]  ;;  %v1023_v26 = vmax.f32 %v2206_v5, %v2190_v10  ;;  %v1024_v39 = vmax.f32 %v2208_v31, %v2192_v57  ;;  %613 = vst.msk [vmem:[#allocation2 + $0x100] sm:$0xff] %vm578_vm4, %v576_v60 }
 0x12d   : > { %v1040_v15 = vmax.f32 %v1930_v58, %v1008_v6  ;;  %v2231_v16 = vmax.f32 %v2605_v40, %v897_v29  ;;  %v2606_v56 = vmax.f32 %v1982_v24, 0.0  ;;  %v1009_v58 = vmax.f32 %v2078_v13, %v2210_v9  ;;  %v739_v21 = vld [vmem:[#allocation2 + $0xe7] sm:$0xff]  ;;  %1071 = vst.msk [vmem:[%s2039_s17 + $0x18] sm:$0xff] %vm578_vm4, %v1039_v53  ;;  %v820_v53 = vld [vmem:[#allocation2 + $0x71] sm:$0xff] }
 0x12e   : > { %945 = vst.msk [vmem:[#allocation2 + $0x58] sm:$0xff] %vm578_vm4, %v2200_v46  ;;  %946 = vst.msk [vmem:[#allocation2 + $0x60] sm:$0xff] %vm578_vm4, %v2204_v52  ;;  %v1010_v6 = vmax.f32 %v2080_v25, %v2212_v62  ;;  %v2607_v50 = vand.u32 15, %v1718_v2  ;;  %v2247_v35 = vld [vmem:[#allocation2 + $0xa8] sm:$0xff]  ;;  %v1055_v3 = vmax.f32 %v1957_v38, %v1023_v26  ;;  %v1056_v24 = vmax.f32 %v1941_v41, %v1024_v39 }
 0x12f   : > { %v2235_v18 = vmax.f32 %v2606_v56, %v898_v33  ;;  %1072 = vst.msk [vmem:[%s2039_s17 + $0x20] sm:$0xff] %vm578_vm4, %v1040_v15  ;;  %v679_v13 = vand.u32 15, %v1769_v55  ;;  %v2256_v25 = vld [vmem:[#allocation2 + $0xc8] sm:$0xff]  ;;  %961 = vst.msk [vmem:[#allocation2 + $0xd8] sm:$0xff] %vm578_vm4, %v2231_v16  ;;  %v1041_v33 = vmax.f32 %v1988_v17, %v1009_v58  ;;  %v2614_v17 = vld [vmem:[#allocation6_spill] sm:$0xff] }
 0x130   : > { %vm2243_vm1 = vcmp.gt.s32.totalorder %v2607_v50, 0  ;;  %v724_v2 = vld [vmem:[#allocation2 + $0x6f] sm:$0xff]  ;;  %v1042_v55 = vmax.f32 %v1992_v54, %v1010_v6  ;;  %v1025_v26 = vmax.f32 %v2247_v35, %v2256_v25  ;;  %1087 = vst.msk [vmem:[%s2039_s17 + $0x98] sm:$0xff] %vm578_vm4, %v1055_v3  ;;  %1088 = vst.msk [vmem:[%s2039_s17 + $0xa0] sm:$0xff] %vm578_vm4, %v1056_v24  ;;  %v2615_v56 = vand.u32 15, %v2614_v17 }
 0x131   : > { %962 = vst.msk [vmem:[#allocation2 + $0xe0] sm:$0xff] %vm578_vm4, %v2235_v18  ;;  %v819_v38 = vld [vmem:[#allocation2 + $0x69] sm:$0xff]  ;;  %v756_v39 = vsel %vm2094_vm11, %v724_v2, 0.0  ;;  %v726_v24 = vld [vmem:[#allocation2 + $0x7f] sm:$0xff]  ;;  %1073 = vst.msk [vmem:[%s2039_s17 + $0x28] sm:$0xff] %vm578_vm4, %v1041_v33  ;;  %vm2303_vm6 = vcmp.lt.s32.totalorder %v679_v13, 15 }
 0x132   : > { %v2610_v43 = vld [vmem:[#allocation4_spill] sm:$0xff]  ;;  %v851_v15 = vsel %vm2100_vm12, %v819_v38, 0.0  ;;  %vm2282_vm3 = vcmp.gt.s32.totalorder %v2615_v56, 0  ;;  %v2618_v58 = vld [vmem:[#allocation5_spill] sm:$0xff]  ;;  %v884_v34 = vmax.f32 %v756_v39, %v820_v53  ;;  %1074 = vst.msk [vmem:[%s2039_s17 + $0x30] sm:$0xff] %vm578_vm4, %v1042_v55  ;;  %v758_v1 = vsel %vm2243_vm1, %v726_v24, 0.0 }
 0x133   : > { %v2611_v41 = vand.u32 15, %v2610_v43  ;;  %v740_v40 = vld [vmem:[#allocation2 + $0xef] sm:$0xff]  ;;  %v2619_v6 = vand.u32 15, %v2618_v58  ;;  %v883_v50 = vmax.f32 %v723_v12, %v851_v15  ;;  %v1057_v43 = vmax.f32 %v2032_v27, %v1025_v26  ;;  %v727_v56 = vld [vmem:[#allocation2 + $0x87] sm:$0xff]  ;;  %v821_v39 = vld [vmem:[#allocation2 + $0x79] sm:$0xff] }
 0x134   : > { %v772_v2 = vsel %vm2124_vm13, %v740_v40, 0.0  ;;  %v835_v3 = vld [vmem:[#allocation2 + $0xe9] sm:$0xff]  ;;  %v836_v38 = vld [vmem:[#allocation2 + $0xf1] sm:$0xff]  ;;  %v2624_v33 = vmax.f32 %v1895_v8, 0.0  ;;  %v2625_v27 = vmax.f32 %v2072_v63, 0.0  ;;  %v822_v40 = vld [vmem:[#allocation2 + $0x81] sm:$0xff] }
 0x135   : > { %vm2264_vm2 = vcmp.lt.s32.totalorder %v2611_v41, 15  ;;  %vm2288_vm5 = vcmp.lt.s32.totalorder %v2619_v6, 15  ;;  %v867_v41 = vsel %vm2133_vm14, %v835_v3, 0.0  ;;  %v900_v17 = vmax.f32 %v772_v2, %v836_v38  ;;  %v728_v12 = vld [vmem:[#allocation2 + $0x8f] sm:$0xff]  ;;  %v742_v58 = vld [vmem:[#allocation2 + $0xff] sm:$0xff]  ;;  %1089 = vst.msk [vmem:[%s2039_s17 + $0xa8] sm:$0xff] %vm578_vm4, %v1057_v43 }
 0x136   : > { %v2309_v55 = vmax.f32 %v2624_v33, %v883_v50  ;;  %v2313_v26 = vmax.f32 %v2625_v27, %v884_v34  ;;  %v899_v61 = vmax.f32 %v739_v21, %v867_v41  ;;  %v760_v15 = vsel %vm2155_vm15, %v728_v12, 0.0  ;;  %v823_v45 = vld [vmem:[#allocation2 + $0x89] sm:$0xff]  ;;  %v725_v13 = vld [vmem:[#allocation2 + $0x77] sm:$0xff]  ;;  %v2329_v28 = vld [vmem:[#allocation2 + $0x60] sm:$0xff] }
 0x137   : > { %v2626_v6 = vmax.f32 %v2076_v11, 0.0  ;;  %v853_v8 = vsel %vm2264_vm2, %v821_v39, 0.0  ;;  %v855_v63 = vsel %vm2179_vm0, %v823_v45, 0.0  ;;  %v886_v21 = vmax.f32 %v758_v1, %v822_v40  ;;  %v2327_v50 = vld [vmem:[#allocation2 + $0x58] sm:$0xff]  ;;  %v839_v43 = vld [vmem:[#allocation2 + $0x109] sm:$0xff]  ;;  %v838_v39 = vld [vmem:[#allocation2 + $0x101] sm:$0xff] }
 0x138   : > { %947 = vst.msk [vmem:[#allocation2 + $0x68] sm:$0xff] %vm578_vm4, %v2309_v55  ;;  %948 = vst.msk [vmem:[#allocation2 + $0x70] sm:$0xff] %vm578_vm4, %v2313_v26  ;;  %v741_v11 = vld [vmem:[#allocation2 + $0xf7] sm:$0xff]  ;;  %v2627_v34 = vmax.f32 %v1918_v7, 0.0  ;;  %v885_v29 = vmax.f32 %v725_v13, %v853_v8  ;;  %v887_v38 = vmax.f32 %v727_v56, %v855_v63  ;;  %v888_v19 = vmax.f32 %v760_v15, %v1910_v0  ;;  %v2346_v12 = vld [vmem:[#allocation2 + $0xe0] sm:$0xff] }
 0x139   : > { %v2321_v2 = vmax.f32 %v2626_v6, %v900_v17  ;;  %v837_v24 = vld [vmem:[#allocation2 + $0xf9] sm:$0xff]  ;;  %v2628_v41 = vmax.f32 %v2111_v30, 0.0  ;;  %v1011_v7 = vmax.f32 %v2159_v14, %v2327_v50  ;;  %v1012_v1 = vmax.f32 %v2161_v37, %v2329_v28  ;;  %v743_v56 = vld [vmem:[#allocation2 + $0x107] sm:$0xff]  ;;  %v994_v54 = vld [vmem:[#allocation2 + $0xd0] sm:$0xff] }
 0x13a   : > { %v2337_v3 = vmax.f32 %v2627_v34, %v899_v61  ;;  %v774_v0 = vsel %vm2282_vm3, %v742_v58, 0.0  ;;  %v2629_v30 = vmax.f32 %v2007_v22, 0.0  ;;  %v2362_v27 = vmax.f32 %v561_v51, %v887_v38  ;;  %v2630_v14 = vld [vmem:[#allocation3_spill] sm:$0xff]  ;;  %v2368_v40 = vld [vmem:[#allocation2 + $0xd8] sm:$0xff] }
 0x13b   : > { %964 = vst.msk [vmem:[#allocation2 + $0xf0] sm:$0xff] %vm578_vm4, %v2321_v2  ;;  %v2344_v17 = vmax.f32 %v2628_v41, %v886_v21  ;;  %v2631_v61 = vmax.f32 %v2630_v14, 0.0  ;;  %v1028_v37 = vmax.f32 %v2192_v57, %v2346_v12  ;;  %v1043_v22 = vmax.f32 %v2060_v47, %v1011_v7  ;;  %v990_v57 = vld [vmem:[#allocation2 + $0xb0] sm:$0xff] }
 0x13c   : > { %963 = vst.msk [vmem:[#allocation2 + $0xe8] sm:$0xff] %vm578_vm4, %v2337_v3  ;;  %v2358_v33 = vmax.f32 %v2629_v30, %v885_v29  ;;  %v1044_v42 = vmax.f32 %v2064_v23, %v1012_v1  ;;  %v869_v51 = vsel %vm2288_vm5, %v837_v24, 0.0  ;;  %v871_v45 = vsel %vm2303_vm6, %v839_v43, 0.0  ;;  %951 = vst.msk [vmem:[#allocation2 + $0x88] sm:$0xff] %vm578_vm4, %v2362_v27 }
 0x13d   : > { %v920_v15 = vmax.f32 %v2631_v61, %v888_v19  ;;  %950 = vst.msk [vmem:[#allocation2 + $0x80] sm:$0xff] %vm578_vm4, %v2344_v17  ;;  %v1060_v47 = vmax.f32 %v2115_v49, %v1028_v37  ;;  %v901_v58 = vmax.f32 %v741_v11, %v869_v51  ;;  %v902_v13 = vmax.f32 %v774_v0, %v838_v39  ;;  %v1002_v11 = vld [vmem:[#allocation2 + $0x110] sm:$0xff] }
 0x13e   : > { %949 = vst.msk [vmem:[#allocation2 + $0x78] sm:$0xff] %vm578_vm4, %v2358_v33  ;;  %v903_v23 = vmax.f32 %v743_v56, %v871_v45  ;;  %1075 = vst.msk [vmem:[%s2039_s17 + $0x38] sm:$0xff] %vm578_vm4, %v1043_v22  ;;  %v1026_v59 = vmax.f32 %v990_v57, %v994_v54  ;;  %v1027_v53 = vmax.f32 %v2190_v10, %v2368_v40  ;;  %v2632_v6 = vmax.f32 %v2053_v4, 0.0 }
 0x13f   : > { %952 = vst.msk [vmem:[#allocation2 + $0x90] sm:$0xff] %vm578_vm4, %v920_v15  ;;  %1076 = vst.msk [vmem:[%s2039_s17 + $0x40] sm:$0xff] %vm578_vm4, %v1044_v42  ;;  %v934_v49 = vmax.f32 %v576_v60, %v902_v13  ;;  %v2633_v63 = vmax.f32 %v2108_v36, 0.0  ;;  %v981_v34 = vld [vmem:[#allocation2 + $0x68] sm:$0xff]  ;;  %v982_v29 = vld [vmem:[#allocation2 + $0x70] sm:$0xff] }
 0x140   : > { %1092 = vst.msk [vmem:[%s2039_s17 + $0xc0] sm:$0xff] %vm578_vm4, %v1060_v47  ;;  %v2394_v8 = vmax.f32 %v2632_v6, %v901_v58  ;;  %v1058_v10 = vmax.f32 %v2015_v44, %v1026_v59  ;;  %v1059_v38 = vmax.f32 %v2090_v32, %v1027_v53  ;;  %v1013_v4 = vmax.f32 %v2210_v9, %v981_v34 }
 0x141   : > { %v2400_v21 = vmax.f32 %v2633_v63, %v903_v23  ;;  %v1014_v19 = vmax.f32 %v2212_v62, %v982_v29  ;;  %966 = vst.msk [vmem:[#allocation2 + $0x100] sm:$0xff] %vm578_vm4, %v934_v49 }
 0x142   : > { %965 = vst.msk [vmem:[#allocation2 + $0xf8] sm:$0xff] %vm578_vm4, %v2394_v8  ;;  %v998_v36 = vld [vmem:[#allocation2 + $0xf0] sm:$0xff]  ;;  %1090 = vst.msk [vmem:[%s2039_s17 + $0xb0] sm:$0xff] %vm578_vm4, %v1058_v10  ;;  %v1045_v32 = vmax.f32 %v2200_v46, %v1013_v4 }
 0x143   : > { %967 = vst.msk [vmem:[#allocation2 + $0x108] sm:$0xff] %vm578_vm4, %v2400_v21  ;;  %v997_v20 = vld [vmem:[#allocation2 + $0xe8] sm:$0xff]  ;;  %v1030_v60 = vmax.f32 %v994_v54, %v998_v36  ;;  %v1034_v24 = vmax.f32 %v998_v36, %v1002_v11  ;;  %1091 = vst.msk [vmem:[%s2039_s17 + $0xb8] sm:$0xff] %vm578_vm4, %v1059_v38  ;;  %v1046_v9 = vmax.f32 %v2204_v52, %v1014_v19 }
 0x144   : > { %v984_v44 = vld [vmem:[#allocation2 + $0x80] sm:$0xff]  ;;  %v1029_v62 = vmax.f32 %v2256_v25, %v997_v20  ;;  %v985_v41 = vld [vmem:[#allocation2 + $0x88] sm:$0xff]  ;;  %1077 = vst.msk [vmem:[%s2039_s17 + $0x48] sm:$0xff] %vm578_vm4, %v1045_v32 }
 0x145   : > { %v983_v43 = vld [vmem:[#allocation2 + $0x78] sm:$0xff]  ;;  %v1016_v1 = vmax.f32 %v2329_v28, %v984_v44  ;;  %v1020_v56 = vmax.f32 %v984_v44, %v2208_v31  ;;  %v1062_v0 = vmax.f32 %v2235_v18, %v1030_v60  ;;  %v1066_v39 = vmax.f32 %v934_v49, %v1034_v24  ;;  %1078 = vst.msk [vmem:[%s2039_s17 + $0x50] sm:$0xff] %vm578_vm4, %v1046_v9 }
 0x146   : > { %v986_v7 = vld [vmem:[#allocation2 + $0x90] sm:$0xff]  ;;  %v1015_v30 = vmax.f32 %v2327_v50, %v983_v43  ;;  %v1017_v14 = vmax.f32 %v981_v34, %v985_v41  ;;  %v1019_v52 = vmax.f32 %v983_v43, %v2206_v5  ;;  %v1021_v25 = vmax.f32 %v985_v41, %v2247_v35  ;;  %v1003_v18 = vld [vmem:[#allocation2 + $0x118] sm:$0xff] }
 0x147   : > { %v1018_v46 = vmax.f32 %v982_v29, %v986_v7  ;;  %v1022_v28 = vmax.f32 %v986_v7, %v990_v57  ;;  %v1048_v31 = vmax.f32 %v2313_v26, %v1016_v1  ;;  %v1052_v61 = vmax.f32 %v920_v15, %v1020_v56  ;;  %1094 = vst.msk [vmem:[%s2039_s17 + $0xd0] sm:$0xff] %vm578_vm4, %v1062_v0  ;;  %v2634_v15 = vld [vmem:[#allocation7_spill] sm:$0xff] }
 0x148   : > { %1098 = vst.msk [vmem:[%s2039_s17 + $0xf0] sm:$0xff] %vm578_vm4, %v1066_v39  ;;  %v1047_v5 = vmax.f32 %v2309_v55, %v1015_v30  ;;  %v1049_v50 = vmax.f32 %v2358_v33, %v1017_v14  ;;  %v1051_v35 = vmax.f32 %v2362_v27, %v1019_v52  ;;  %v1053_v26 = vmax.f32 %v1903_v48, %v1021_v25  ;;  %v1000_v42 = vld [vmem:[#allocation2 + $0x100] sm:$0xff] }
 0x149   : > { %v1050_v37 = vmax.f32 %v2344_v17, %v1018_v46  ;;  %v1054_v54 = vmax.f32 %v2634_v15, %v1022_v28  ;;  %1080 = vst.msk [vmem:[%s2039_s17 + $0x60] sm:$0xff] %vm578_vm4, %v1048_v31  ;;  %1084 = vst.msk [vmem:[%s2039_s17 + $0x80] sm:$0xff] %vm578_vm4, %v1052_v61  ;;  %v999_v22 = vld [vmem:[#allocation2 + $0xf8] sm:$0xff]  ;;  %v1061_v33 = vmax.f32 %v2231_v16, %v1029_v62 }
 0x14a   : > { %v1001_v55 = vld [vmem:[#allocation2 + $0x108] sm:$0xff]  ;;  %1079 = vst.msk [vmem:[%s2039_s17 + $0x58] sm:$0xff] %vm578_vm4, %v1047_v5  ;;  %1081 = vst.msk [vmem:[%s2039_s17 + $0x68] sm:$0xff] %vm578_vm4, %v1049_v50  ;;  %v1031_v48 = vmax.f32 %v2368_v40, %v999_v22  ;;  %v1032_v17 = vmax.f32 %v2346_v12, %v1000_v42  ;;  %v1035_v51 = vmax.f32 %v999_v22, %v1003_v18 }
 0x14b   : > { %1082 = vst.msk [vmem:[%s2039_s17 + $0x70] sm:$0xff] %vm578_vm4, %v1050_v37  ;;  %1083 = vst.msk [vmem:[%s2039_s17 + $0x78] sm:$0xff] %vm578_vm4, %v1051_v35  ;;  %v1033_v27 = vmax.f32 %v997_v20, %v1001_v55 }
 0x14c   : > { %1085 = vst.msk [vmem:[%s2039_s17 + $0x88] sm:$0xff] %vm578_vm4, %v1053_v26  ;;  %1086 = vst.msk [vmem:[%s2039_s17 + $0x90] sm:$0xff] %vm578_vm4, %v1054_v54  ;;  %v1063_v16 = vmax.f32 %v2337_v3, %v1031_v48  ;;  %v1064_v45 = vmax.f32 %v2321_v2, %v1032_v17  ;;  %v1067_v47 = vmax.f32 %v2400_v21, %v1035_v51 }
 0x14d   : > { %1093 = vst.msk [vmem:[%s2039_s17 + $0xc8] sm:$0xff] %vm578_vm4, %v1061_v33  ;;  %v1065_v57 = vmax.f32 %v2394_v8, %v1033_v27 }
 0x14e   : > { %1095 = vst.msk [vmem:[%s2039_s17 + $0xd8] sm:$0xff] %vm578_vm4, %v1063_v16  ;;  %1096 = vst.msk [vmem:[%s2039_s17 + $0xe0] sm:$0xff] %vm578_vm4, %v1064_v45 }
 0x14f   : > { %1097 = vst.msk [vmem:[%s2039_s17 + $0xe8] sm:$0xff] %vm578_vm4, %v1065_v57  ;;  %1099 = vst.msk [vmem:[%s2039_s17 + $0xf8] sm:$0xff] %vm578_vm4, %v1067_v47 }
 0x150 PF: > { %s13_s12 = sadd.s32 1, %s1360_s12  }
 0x151   : > { %p10_p4 = scmp.ge.s32.totalorder %s13_s12, 4  }
 0x153   :  { %12 = sbr.rel (!%p10_p4) target bundleno = 1 (0x1), region = 62 }

// kernel: model_forward.3
= control target key start
LH: loop header
LB: loop body
LE: loop exit
PB: predicated region body
PF: predicated region fallthrough
CT: control target
= control target key end

     0   :  { %10 = vsyncpa [#allocation4], 0  ;;  %s2567_s18 = smov 0   ;;  %s2569_s19 = smov 0   ;;  %s2835_s0 = inlined_call_operand.vmem [shape: f32[2,8192], index: 0, kind: input, shape index: {}]   ;;  %s2836_s1 = inlined_call_operand.vmem [shape: bf16[8192,128], index: 1, kind: input, shape index: {}]   ;;  %s2837_s2 = inlined_call_operand.vmem [shape: f32[1,128], index: 2, kind: input, shape index: {}]   ;;  %s2838_s3 = inlined_call_operand.vmem [shape: f32[128,10], index: 3, kind: input, shape index: {}]   ;;  %s2839_s4 = inlined_call_operand.vmem [shape: f32[1,10], index: 4, kind: input, shape index: {}]   ;;  %s2840_s5 = inlined_call_operand.hbm [shape: f32[2,10], index: 5, kind: output, shape index: {}]  }
   0x1   :  { %s2571_s20 = smov 0  }
   0x2 LB: > { %s1913_s21 = sadd.s32 4294967295, %s2529_s20   ;;  %s25_s22 = sadd.s32 1, %s2525_s19  ;;  %s2529_s20 = sphi %s2571_s20, %s16_s20   ;;  %s2525_s19 = sphi %s2569_s19, %s2843_s19   ;;  %s2521_s18 = sphi %s2567_s18, %s2842_s18  }
   0x3   : > { %p26_p0 = scmp.ge.s32.totalorder %s25_s22, 4  ;;  %p1916_p1 = scmp.ge.s32.totalorder %s2529_s20, 1 }
   0x4   : > { %p218_p2 = scmp.lt.s32.totalorder %s2529_s20, 5 }
   0x5   : > { %s2845_s22 = smov (%p26_p0, %s25_s22), 0 }
   0x6   : > { %p219_p3 = pnand %p1916_p1, %p218_p2 }
   0x7   : > { %s1917_s23 = sshll.u32 (!%p219_p3), %s2521_s18, 4  ;;  %s1919_s24 = sshll.u32 (!%p219_p3), %s2521_s18, 8 }
   0x8   : > { %222 = sbr.rel (%p219_p3) target bundleno = 628 (0x274), region = 40  ;;  %p253_p4 = scmp.lt.s32.totalorder (!%p219_p3), %s1917_s23, 63 }
   0x9   : > { %p261_p5 = scmp.lt.s32.totalorder (!%p219_p3), %s1919_s24, 1023  ;;  %p1921_p6 = scmp.ne.s32.totalorder (!%p219_p3), %s2521_s18, 0 }
   0xf   : > { %s2847_s23 = smov (!%p253_p4, %s1917_s23), 63  ;;  %s2849_s24 = smov (!%p261_p5, %s1919_s24), 1023 }
  0x10   : > { %s1918_s25 = sshll.u32 %s2847_s23, 1  ;;  %s1920_s29 = sshll.u32 %s2849_s24, 2  ;;  %v2531_v0 = vmov (!%p1921_p6), 0.0  }
  0x11   : > { %s2593_s28 = scalar_lea.vmem %s2835_s0, %s1918_s25  ;;  %s2598_s7 = scalar_lea.vmem %s2836_s1, %s1920_s29  ;;  %271 = vst [vmem:[#allocation2] sm:$0x3] (!%p1921_p6), %v2531_v0 }
  0x12   : > { %270 = sbr.rel (%p1921_p6) target bundleno = 25 (0x19), region = 44 }
  0x19 PF: > { %v2345_v1 = vld [vmem:[%s2598_s7 + $0x40] sm:$0xff]   ;;  %v2349_v5 = vld [vmem:[%s2598_s7 + $0x48] sm:$0xff]   ;;  %v2353_v9 = vld [vmem:[%s2598_s7 + $0x50] sm:$0xff]   ;;  %v285_v29 = vlaneseq  ;;  %v2532_v37 = vmov 1983009808   ;;  %p2050_p7 = scmp.ne.s32.totalorder %s2521_s18, 3 }
  0x1a   : > { %v2346_v2 = vld [vmem:[%s2598_s7 + $0xc0] sm:$0xff]   ;;  %2057 = vmatprep.subr.bf16.mxu0 %v2345_v1  ;;  %v2350_v6 = vld [vmem:[%s2598_s7 + $0xc8] sm:$0xff]   ;;  %v2354_v10 = vld [vmem:[%s2598_s7 + $0xd0] sm:$0xff]   ;;  %v283_v38 = vunpack.c.l.s4 %v2532_v37  ;;  %vm2534_vm0 = vmmov (!%p2050_p7), 0   ;;  %vm1834_vm1 = vcmask (!%p2050_p7), 74752  }
  0x1b   : > { %v2347_v3 = vld [vmem:[%s2598_s7] sm:$0xff]   ;;  %2079 = vmatprep.subr.bf16.mxu1 %v2346_v2  ;;  %v2351_v7 = vld [vmem:[%s2598_s7 + $0x8] sm:$0xff]   ;;  %v2355_v11 = vld [vmem:[%s2598_s7 + $0x10] sm:$0xff]   ;;  %v286_v34 = vshrl.u32 %v285_v29, 7 }
  0x1c   : > { %v2348_v4 = vld [vmem:[%s2598_s7 + $0x80] sm:$0xff]   ;;  %2058 = vmatpush3.bf16.msra.mxu0 %v2347_v3  ;;  %v2352_v8 = vld [vmem:[%s2598_s7 + $0x88] sm:$0xff]   ;;  %v2356_v12 = vld [vmem:[%s2598_s7 + $0x90] sm:$0xff]   ;;  %v284_v40 = vunpack.c.0.s8 %v283_v38 }
  0x1d   : > { %2080 = vmatpush3.bf16.msra.mxu1 %v2348_v4  ;;  %2059 = vmatprep.subr.bf16.mxu0 %v2349_v5  ;;  %v2357_v13 = vld [vmem:[%s2598_s7 + $0x58] sm:$0xff]   ;;  %v2361_v17 = vld [vmem:[%s2598_s7 + $0x60] sm:$0xff]   ;;  %v2365_v21 = vld [vmem:[%s2598_s7 + $0x68] sm:$0xff]  }
  0x1e   : > { %2081 = vmatprep.subr.bf16.mxu1 %v2350_v6  ;;  %v2358_v14 = vld [vmem:[%s2598_s7 + $0xd8] sm:$0xff]   ;;  %v2362_v18 = vld [vmem:[%s2598_s7 + $0xe0] sm:$0xff]   ;;  %v2366_v22 = vld [vmem:[%s2598_s7 + $0xe8] sm:$0xff]   ;;  %v2636_v42 = vsub.s32 %v284_v40, %v286_v34 }
  0x1f   : > { %v2359_v15 = vld [vmem:[%s2598_s7 + $0x18] sm:$0xff]   ;;  %v2363_v19 = vld [vmem:[%s2598_s7 + $0x20] sm:$0xff]   ;;  %v2367_v23 = vld [vmem:[%s2598_s7 + $0x28] sm:$0xff]  }
  0x20   : > { %2060 = vmatpush3.bf16.msra.mxu0 %v2351_v7  ;;  %v2360_v16 = vld [vmem:[%s2598_s7 + $0x98] sm:$0xff]   ;;  %v2364_v20 = vld [vmem:[%s2598_s7 + $0xa0] sm:$0xff]   ;;  %v2368_v24 = vld [vmem:[%s2598_s7 + $0xa8] sm:$0xff]  }
  0x21   : > { %2082 = vmatpush3.bf16.msra.mxu1 %v2352_v8  ;;  %2061 = vmatprep.subr.bf16.mxu0 %v2353_v9  ;;  %v2369_v25 = vld [vmem:[%s2598_s7 + $0x70] sm:$0xff]   ;;  %v2373_v30 = vld [vmem:[%s2598_s7 + $0x78] sm:$0xff]   ;;  %v273_v35 = vld [vmem:[%s2593_s28] sm:$0xff] }
  0x22   : > { %2083 = vmatprep.subr.bf16.mxu1 %v2354_v10  ;;  %v2370_v26 = vld [vmem:[%s2598_s7 + $0xf0] sm:$0xff]   ;;  %v2374_v31 = vld [vmem:[%s2598_s7 + $0xf8] sm:$0xff]   ;;  %v2378_v36 = vld [vmem:[%s2598_s7 + $0x140] sm:$0xff]   ;;  %v281_v41 = vcombine.high %v273_v35, %v273_v35  ;;  %v288_v43 = vrot.slane %v273_v35, %v2636_v42 }
  0x23   : > { %v2371_v27 = vld [vmem:[%s2598_s7 + $0x30] sm:$0xff]   ;;  %v2375_v32 = vld [vmem:[%s2598_s7 + $0x38] sm:$0xff]   ;;  %v2379_v39 = vld [vmem:[%s2598_s7 + $0x1c0] sm:$0xff]  }
  0x24   : > { %2062 = vmatpush3.bf16.msra.mxu0 %v2355_v11  ;;  %v2372_v28 = vld [vmem:[%s2598_s7 + $0xb0] sm:$0xff]   ;;  %v2376_v33 = vld [vmem:[%s2598_s7 + $0xb8] sm:$0xff]   ;;  %v295_v44 = vrot.slane %v281_v41, %v2636_v42  ;;  %v296_v45 = vcombine.high %v288_v43, %v288_v43  ;;  %v2380_v47 = vld [vmem:[%s2598_s7 + $0x100] sm:$0xff]   ;;  %v365_v48 = vpack.c.bf16 %v288_v43, %v288_v43 }
  0x25   : > { %2084 = vmatpush3.bf16.msra.mxu1 %v2356_v12  ;;  %2063 = vmatprep.subr.bf16.mxu0 %v2357_v13  ;;  %v2381_v50 = vld [vmem:[%s2598_s7 + $0x180] sm:$0xff]   ;;  %v2382_v53 = vld [vmem:[%s2598_s7 + $0x148] sm:$0xff]   ;;  %v2386_v57 = vld [vmem:[%s2598_s7 + $0x150] sm:$0xff]  }
  0x26   : > { %2085 = vmatprep.subr.bf16.mxu1 %v2358_v14  ;;  %v297_v46 = vcombine.high %v295_v44, %v295_v44  ;;  %v367_v49 = vpack.c.bf16 %v295_v44, %v295_v44  ;;  %v366_v51 = vpack.c.bf16 %v296_v45, %v296_v45  ;;  %v2383_v54 = vld [vmem:[%s2598_s7 + $0x1c8] sm:$0xff]   ;;  %v2387_v58 = vld [vmem:[%s2598_s7 + $0x1d0] sm:$0xff]   ;;  %v2390_v61 = vld [vmem:[%s2598_s7 + $0x158] sm:$0xff]  }
  0x27   : > { %v2384_v55 = vld [vmem:[%s2598_s7 + $0x108] sm:$0xff]   ;;  %v2388_v59 = vld [vmem:[%s2598_s7 + $0x110] sm:$0xff]   ;;  %v2391_v62 = vld [vmem:[%s2598_s7 + $0x1d8] sm:$0xff]  }
  0x28   : > { %2064 = vmatpush3.bf16.msra.mxu0 %v2359_v15  ;;  %v368_v52 = vpack.c.bf16 %v297_v46, %v297_v46  ;;  %1437 = vmatprep.mubr.bf16.mxu0 %v366_v51  ;;  %v2385_v56 = vld [vmem:[%s2598_s7 + $0x188] sm:$0xff]   ;;  %v2389_v60 = vld [vmem:[%s2598_s7 + $0x190] sm:$0xff]   ;;  %v2392_v63 = vld [vmem:[%s2598_s7 + $0x118] sm:$0xff]  }
  0x29   : > { %2086 = vmatpush3.bf16.msra.mxu1 %v2360_v16  ;;  %2065 = vmatprep.subr.bf16.mxu0 %v2361_v17  ;;  %v2393_v0 = vld [vmem:[%s2598_s7 + $0x198] sm:$0xff]   ;;  %v2394_v1 = vld [vmem:[%s2598_s7 + $0x160] sm:$0xff]   ;;  %v2398_v5 = vld [vmem:[%s2598_s7 + $0x168] sm:$0xff]  }
  0x2a   : > { %2087 = vmatprep.subr.bf16.mxu1 %v2362_v18  ;;  %1477 = vmatprep.mubr.bf16.mxu1 %v368_v52  ;;  %v2395_v2 = vld [vmem:[%s2598_s7 + $0x1e0] sm:$0xff]   ;;  %v2399_v6 = vld [vmem:[%s2598_s7 + $0x1e8] sm:$0xff]   ;;  %v2402_v9 = vld [vmem:[%s2598_s7 + $0x170] sm:$0xff]  }
  0x2b   : > { %v2396_v3 = vld [vmem:[%s2598_s7 + $0x120] sm:$0xff]   ;;  %v2400_v7 = vld [vmem:[%s2598_s7 + $0x128] sm:$0xff]   ;;  %v2403_v10 = vld [vmem:[%s2598_s7 + $0x1f0] sm:$0xff]  }
  0x2c   : > { %2066 = vmatpush3.bf16.msra.mxu0 %v2363_v19  ;;  %v2397_v4 = vld [vmem:[%s2598_s7 + $0x1a0] sm:$0xff]   ;;  %v2401_v8 = vld [vmem:[%s2598_s7 + $0x1a8] sm:$0xff]   ;;  %v2404_v12 = vld [vmem:[%s2598_s7 + $0x130] sm:$0xff]  }
  0x2d   : > { %2088 = vmatpush3.bf16.msra.mxu1 %v2364_v20  ;;  %2067 = vmatprep.subr.bf16.mxu0 %v2365_v21  ;;  %v274_v11 = vld [vmem:[%s2593_s28 + $0x8] sm:$0xff]  ;;  %v2405_v15 = vld [vmem:[%s2598_s7 + $0x1b0] sm:$0xff]   ;;  %v2406_v16 = vld [vmem:[%s2598_s7 + $0x178] sm:$0xff]  }
  0x2e   : > { %2089 = vmatprep.subr.bf16.mxu1 %v2366_v22  ;;  %v305_v13 = vrot.slane %v274_v11, %v2636_v42  ;;  %v298_v14 = vcombine.high %v274_v11, %v274_v11  ;;  %v2407_v19 = vld [vmem:[%s2598_s7 + $0x1f8] sm:$0xff]   ;;  %v2418_v34 = vld [vmem:[%s2598_s7 + $0x288] sm:$0xff]   ;;  %v2419_v35 = vld [vmem:[%s2598_s7 + $0x250] sm:$0xff]  }
  0x2f   : > { %v2408_v20 = vld [vmem:[%s2598_s7 + $0x138] sm:$0xff]   ;;  %v2421_v37 = vld [vmem:[%s2598_s7 + $0x210] sm:$0xff]   ;;  %v2427_v44 = vld [vmem:[%s2598_s7 + $0x260] sm:$0xff]  }
  0x30   : > { %2068 = vmatpush3.bf16.msra.mxu0 %v2367_v23  ;;  %v313_v17 = vcombine.high %v305_v13, %v305_v13  ;;  %v312_v18 = vrot.slane %v298_v14, %v2636_v42  ;;  %v2409_v23 = vld [vmem:[%s2598_s7 + $0x1b8] sm:$0xff]   ;;  %v2422_v38 = vld [vmem:[%s2598_s7 + $0x290] sm:$0xff]   ;;  %v2428_v45 = vld [vmem:[%s2598_s7 + $0x2e0] sm:$0xff]  }
  0x31   : > { %2090 = vmatpush3.bf16.msra.mxu1 %v2368_v24  ;;  %2069 = vmatprep.subr.bf16.mxu0 %v2369_v25  ;;  %v2411_v25 = vld [vmem:[%s2598_s7 + $0x240] sm:$0xff]   ;;  %v2424_v40 = vld [vmem:[%s2598_s7 + $0x2d8] sm:$0xff]   ;;  %v2434_v51 = vld [vmem:[%s2598_s7 + $0x2a8] sm:$0xff]  }
  0x32   : > { %2091 = vmatprep.subr.bf16.mxu1 %v2370_v26  ;;  %v370_v21 = vpack.c.bf16 %v313_v17, %v313_v17  ;;  %v314_v22 = vcombine.high %v312_v18, %v312_v18  ;;  %v2412_v26 = vld [vmem:[%s2598_s7 + $0x2c0] sm:$0xff]   ;;  %v371_v29 = vpack.c.bf16 %v312_v18, %v312_v18  ;;  %v2425_v41 = vld [vmem:[%s2598_s7 + $0x218] sm:$0xff]   ;;  %v2435_v52 = vld [vmem:[%s2598_s7 + $0x270] sm:$0xff]  }
  0x33   : > { %v2426_v43 = vld [vmem:[%s2598_s7 + $0x298] sm:$0xff]   ;;  %v2429_v46 = vld [vmem:[%s2598_s7 + $0x220] sm:$0xff]   ;;  %v2449_v11 = vld [vmem:[%s2598_s7 + $0x3c8] sm:$0xff]  }
  0x34   : > { %2070 = vmatpush3.bf16.msra.mxu0 %v2371_v27  ;;  %v372_v24 = vpack.c.bf16 %v314_v22, %v314_v22  ;;  %v2413_v27 = vld [vmem:[%s2598_s7 + $0x200] sm:$0xff]   ;;  %v2452_v14 = vld [vmem:[%s2598_s7 + $0x350] sm:$0xff]   ;;  %v2456_v18 = vld [vmem:[%s2598_s7 + $0x358] sm:$0xff]  }
  0x35   : > { %2092 = vmatpush3.bf16.msra.mxu1 %v2372_v28  ;;  %2071 = vmatprep.subr.bf16.mxu0 %v2373_v30  ;;  %v369_v28 = vpack.c.bf16 %v305_v13, %v305_v13  ;;  %v2414_v30 = vld [vmem:[%s2598_s7 + $0x280] sm:$0xff]   ;;  %v2451_v13 = vld [vmem:[%s2598_s7 + $0x388] sm:$0xff]   ;;  %v2455_v17 = vld [vmem:[%s2598_s7 + $0x390] sm:$0xff]  }
  0x36   : > { %2093 = vmatprep.subr.bf16.mxu1 %v2374_v31  ;;  %v2415_v31 = vld [vmem:[%s2598_s7 + $0x248] sm:$0xff]   ;;  %v2460_v22 = vld [vmem:[%s2598_s7 + $0x360] sm:$0xff]  }
  0x38   : > { %2072 = vmatpush3.bf16.msra.mxu0 %v2375_v32  ;;  %v2416_v32 = vld [vmem:[%s2598_s7 + $0x2c8] sm:$0xff]  }
  0x39   : > { %2094 = vmatpush3.bf16.msra.mxu1 %v2376_v33  ;;  %2101 = vmatprep.subr.bf16.mxu0 %v2378_v36  ;;  %v2417_v33 = vld [vmem:[%s2598_s7 + $0x208] sm:$0xff]   ;;  %v2420_v36 = vld [vmem:[%s2598_s7 + $0x2d0] sm:$0xff]  }
  0x3a   : > { %2123 = vmatprep.subr.bf16.mxu1 %v2379_v39  ;;  %v2423_v39 = vld [vmem:[%s2598_s7 + $0x258] sm:$0xff]  }
  0x3b   : > { %1438 = vmatmul.mubr.bf16.vlgmr.msra.gmra.mrb[0].mxu0 %v365_v48  ;;  %v2431_v48 = vld [vmem:[%s2598_s7 + $0x268] sm:$0xff]  }
  0x3c   : > { %1478 = vmatmul.mubr.bf16.vlgmr.msra.gmra.mrb[0].mxu1 %v367_v49  ;;  %2102 = vmatpush3.bf16.msra.mxu0 %v2380_v47  ;;  %v2430_v47 = vld [vmem:[%s2598_s7 + $0x2a0] sm:$0xff]   ;;  %v2432_v49 = vld [vmem:[%s2598_s7 + $0x2e8] sm:$0xff]  }
  0x3d   : > { %2124 = vmatpush3.bf16.msra.mxu1 %v2381_v50  ;;  %2103 = vmatprep.subr.bf16.mxu0 %v2382_v53  ;;  %v2433_v50 = vld [vmem:[%s2598_s7 + $0x228] sm:$0xff]   ;;  %v2436_v53 = vld [vmem:[%s2598_s7 + $0x2f0] sm:$0xff]  }
  0x3e   : > { %2125 = vmatprep.subr.bf16.mxu1 %v2383_v54  ;;  %1517 = vmatprep.mubr.bf16.mxu0 %v370_v21  ;;  %v275_v54 = vld [vmem:[%s2593_s28 + $0x10] sm:$0xff]  ;;  %v2459_v21 = vld [vmem:[%s2598_s7 + $0x398] sm:$0xff]  }
  0x3f   : > { %1557 = vmatprep.mubr.bf16.mxu1 %v372_v24  ;;  %v2462_v24 = vld [vmem:[%s2598_s7 + $0x320] sm:$0xff]  }
  0x40   : > { %2104 = vmatpush3.bf16.msra.mxu0 %v2384_v55  ;;  %v2437_v55 = vld [vmem:[%s2598_s7 + $0x230] sm:$0xff]  }
  0x41   : > { %2126 = vmatpush3.bf16.msra.mxu1 %v2385_v56  ;;  %2105 = vmatprep.subr.bf16.mxu0 %v2386_v57  ;;  %v322_v56 = vrot.slane %v275_v54, %v2636_v42  ;;  %v315_v57 = vcombine.high %v275_v54, %v275_v54 }
  0x42   : > { %2127 = vmatprep.subr.bf16.mxu1 %v2387_v58  ;;  %v2438_v58 = vld [vmem:[%s2598_s7 + $0x2b0] sm:$0xff]  }
  0x44   : > { %2106 = vmatpush3.bf16.msra.mxu0 %v2388_v59  ;;  %v2439_v59 = vld [vmem:[%s2598_s7 + $0x278] sm:$0xff]  }
  0x45   : > { %2128 = vmatpush3.bf16.msra.mxu1 %v2389_v60  ;;  %2107 = vmatprep.subr.bf16.mxu0 %v2390_v61  ;;  %v330_v60 = vcombine.high %v322_v56, %v322_v56  ;;  %v329_v61 = vrot.slane %v315_v57, %v2636_v42 }
  0x46   : > { %2129 = vmatprep.subr.bf16.mxu1 %v2391_v62  ;;  %v2440_v62 = vld [vmem:[%s2598_s7 + $0x2f8] sm:$0xff]  }
  0x48   : > { %2108 = vmatpush3.bf16.msra.mxu0 %v2392_v63  ;;  %v2441_v63 = vld [vmem:[%s2598_s7 + $0x238] sm:$0xff]  }
  0x49   : > { %2130 = vmatpush3.bf16.msra.mxu1 %v2393_v0  ;;  %2109 = vmatprep.subr.bf16.mxu0 %v2394_v1  ;;  %v374_v0 = vpack.c.bf16 %v330_v60, %v330_v60  ;;  %v331_v1 = vcombine.high %v329_v61, %v329_v61 }
  0x4a   : > { %2131 = vmatprep.subr.bf16.mxu1 %v2395_v2  ;;  %v2442_v2 = vld [vmem:[%s2598_s7 + $0x2b8] sm:$0xff]  }
  0x4c   : > { %2110 = vmatpush3.bf16.msra.mxu0 %v2396_v3  ;;  %v376_v3 = vpack.c.bf16 %v331_v1, %v331_v1 }
  0x4d   : > { %2132 = vmatpush3.bf16.msra.mxu1 %v2397_v4  ;;  %2111 = vmatprep.subr.bf16.mxu0 %v2398_v5  ;;  %v2444_v4 = vld [vmem:[%s2598_s7 + $0x340] sm:$0xff]  }
  0x4e   : > { %2133 = vmatprep.subr.bf16.mxu1 %v2399_v6  ;;  %v2445_v5 = vld [vmem:[%s2598_s7 + $0x3c0] sm:$0xff]  }
  0x4f   : > { %v2446_v6 = vld [vmem:[%s2598_s7 + $0x300] sm:$0xff]  }
  0x50   : > { %2112 = vmatpush3.bf16.msra.mxu0 %v2400_v7  ;;  %v373_v7 = vpack.c.bf16 %v322_v56, %v322_v56 }
  0x51   : > { %2134 = vmatpush3.bf16.msra.mxu1 %v2401_v8  ;;  %2113 = vmatprep.subr.bf16.mxu0 %v2402_v9  ;;  %v375_v8 = vpack.c.bf16 %v329_v61, %v329_v61  ;;  %v2447_v9 = vld [vmem:[%s2598_s7 + $0x380] sm:$0xff]  }
  0x52   : > { %2135 = vmatprep.subr.bf16.mxu1 %v2403_v10  ;;  %v2448_v10 = vld [vmem:[%s2598_s7 + $0x348] sm:$0xff]  }
  0x54   : > { %2114 = vmatpush3.bf16.msra.mxu0 %v2404_v12  ;;  %v2450_v12 = vld [vmem:[%s2598_s7 + $0x308] sm:$0xff]  }
  0x55   : > { %2136 = vmatpush3.bf16.msra.mxu1 %v2405_v15  ;;  %2115 = vmatprep.subr.bf16.mxu0 %v2406_v16  ;;  %v2453_v15 = vld [vmem:[%s2598_s7 + $0x3d0] sm:$0xff]  }
  0x56   : > { %2137 = vmatprep.subr.bf16.mxu1 %v2407_v19  ;;  %v2454_v16 = vld [vmem:[%s2598_s7 + $0x310] sm:$0xff]   ;;  %v2457_v19 = vld [vmem:[%s2598_s7 + $0x3d8] sm:$0xff]  }
  0x58   : > { %2116 = vmatpush3.bf16.msra.mxu0 %v2408_v20  ;;  %v2458_v20 = vld [vmem:[%s2598_s7 + $0x318] sm:$0xff]  }
  0x59   : > { %2138 = vmatpush3.bf16.msra.mxu1 %v2409_v23  ;;  %2145 = vmatprep.subr.bf16.mxu0 %v2411_v25  ;;  %v2461_v23 = vld [vmem:[%s2598_s7 + $0x3e0] sm:$0xff]  }
  0x5a   : > { %2167 = vmatprep.subr.bf16.mxu1 %v2412_v26  ;;  %v2463_v25 = vld [vmem:[%s2598_s7 + $0x3a0] sm:$0xff]   ;;  %v2464_v26 = vld [vmem:[%s2598_s7 + $0x368] sm:$0xff]  }
  0x5b   : > { %1518 = vmatmul.mubr.bf16.vlgmr.msra.gmra.mrb[4].mxu0 %v369_v28  ;;  %v2466_v28 = vld [vmem:[%s2598_s7 + $0x328] sm:$0xff]  }
  0x5c   : > { %1558 = vmatmul.mubr.bf16.vlgmr.msra.gmra.mrb[4].mxu1 %v371_v29  ;;  %2146 = vmatpush3.bf16.msra.mxu0 %v2413_v27  ;;  %v2465_v27 = vld [vmem:[%s2598_s7 + $0x3e8] sm:$0xff]  }
  0x5d   : > { %2168 = vmatpush3.bf16.msra.mxu1 %v2414_v30  ;;  %2147 = vmatprep.subr.bf16.mxu0 %v2415_v31  ;;  %v2467_v29 = vld [vmem:[%s2598_s7 + $0x3a8] sm:$0xff]   ;;  %v2468_v30 = vld [vmem:[%s2598_s7 + $0x370] sm:$0xff]  }
  0x5e   : > { %2169 = vmatprep.subr.bf16.mxu1 %v2416_v32  ;;  %1597 = vmatprep.mubr.bf16.mxu0 %v374_v0  ;;  %v2469_v31 = vld [vmem:[%s2598_s7 + $0x3f0] sm:$0xff]   ;;  %v276_v32 = vld [vmem:[%s2593_s28 + $0x18] sm:$0xff] }
  0x5f   : > { %1637 = vmatprep.mubr.bf16.mxu1 %v376_v3 }
  0x60   : > { %2148 = vmatpush3.bf16.msra.mxu0 %v2417_v33  ;;  %v339_v33 = vrot.slane %v276_v32, %v2636_v42 }
  0x61   : > { %2170 = vmatpush3.bf16.msra.mxu1 %v2418_v34  ;;  %2149 = vmatprep.subr.bf16.mxu0 %v2419_v35  ;;  %v332_v34 = vcombine.high %v276_v32, %v276_v32  ;;  %v2470_v35 = vld [vmem:[%s2598_s7 + $0x330] sm:$0xff]  }
  0x62   : > { %2171 = vmatprep.subr.bf16.mxu1 %v2420_v36  ;;  %v2471_v36 = vld [vmem:[%s2598_s7 + $0x3b0] sm:$0xff]  }
  0x64   : > { %2150 = vmatpush3.bf16.msra.mxu0 %v2421_v37  ;;  %v2472_v37 = vld [vmem:[%s2598_s7 + $0x378] sm:$0xff]  }
  0x65   : > { %2172 = vmatpush3.bf16.msra.mxu1 %v2422_v38  ;;  %2151 = vmatprep.subr.bf16.mxu0 %v2423_v39  ;;  %v2473_v38 = vld [vmem:[%s2598_s7 + $0x3f8] sm:$0xff]   ;;  %v347_v39 = vcombine.high %v339_v33, %v339_v33 }
  0x66   : > { %2173 = vmatprep.subr.bf16.mxu1 %v2424_v40  ;;  %v346_v40 = vrot.slane %v332_v34, %v2636_v42  ;;  %v1742_v34 = vld [vmem:[%s2838_s3 + $0x8] sm:$0xff] (!%p2050_p7) }
  0x68   : > { %2152 = vmatpush3.bf16.msra.mxu0 %v2425_v41  ;;  %v378_v41 = vpack.c.bf16 %v347_v39, %v347_v39  ;;  %v2535_v39 = vmov (!%p2050_p7), 0.0  }
  0x69   : > { %2174 = vmatpush3.bf16.msra.mxu1 %v2426_v43  ;;  %2153 = vmatprep.subr.bf16.mxu0 %v2427_v44  ;;  %v348_v43 = vcombine.high %v346_v40, %v346_v40  ;;  %v2474_v44 = vld [vmem:[%s2598_s7 + $0x338] sm:$0xff]  }
  0x6a   : > { %2175 = vmatprep.subr.bf16.mxu1 %v2428_v45  ;;  %v2475_v45 = vld [vmem:[%s2598_s7 + $0x3b8] sm:$0xff]  }
  0x6c   : > { %2154 = vmatpush3.bf16.msra.mxu0 %v2429_v46  ;;  %v380_v46 = vpack.c.bf16 %v348_v43, %v348_v43  ;;  %v1746_v43 = vld [vmem:[%s2838_s3 + $0x28] sm:$0xff] (!%p2050_p7) }
  0x6d   : > { %2176 = vmatpush3.bf16.msra.mxu1 %v2430_v47  ;;  %2155 = vmatprep.subr.bf16.mxu0 %v2431_v48  ;;  %v377_v47 = vpack.c.bf16 %v339_v33, %v339_v33  ;;  %v379_v48 = vpack.c.bf16 %v346_v40, %v346_v40  ;;  %v1741_v33 = vld [vmem:[%s2838_s3] sm:$0xff] (!%p2050_p7) }
  0x6e   : > { %2177 = vmatprep.subr.bf16.mxu1 %v2432_v49 }
  0x70   : > { %2156 = vmatpush3.bf16.msra.mxu0 %v2433_v50 }
  0x71   : > { %2178 = vmatpush3.bf16.msra.mxu1 %v2434_v51  ;;  %2157 = vmatprep.subr.bf16.mxu0 %v2435_v52 }
  0x72   : > { %2179 = vmatprep.subr.bf16.mxu1 %v2436_v53 }
  0x74   : > { %2158 = vmatpush3.bf16.msra.mxu0 %v2437_v55 }
  0x75   : > { %2180 = vmatpush3.bf16.msra.mxu1 %v2438_v58  ;;  %2159 = vmatprep.subr.bf16.mxu0 %v2439_v59 }
  0x76   : > { %2181 = vmatprep.subr.bf16.mxu1 %v2440_v62 }
  0x78   : > { %2160 = vmatpush3.bf16.msra.mxu0 %v2441_v63 }
  0x79   : > { %2182 = vmatpush3.bf16.msra.mxu1 %v2442_v2  ;;  %2189 = vmatprep.subr.bf16.mxu0 %v2444_v4 }
  0x7a   : > { %2211 = vmatprep.subr.bf16.mxu1 %v2445_v5 }
  0x7b   : > { %1598 = vmatmul.mubr.bf16.vlgmr.msra.gmra.mrb[8].mxu0 %v373_v7 }
  0x7c   : > { %1638 = vmatmul.mubr.bf16.vlgmr.msra.gmra.mrb[8].mxu1 %v375_v8  ;;  %2190 = vmatpush3.bf16.msra.mxu0 %v2446_v6 }
  0x7d   : > { %2212 = vmatpush3.bf16.msra.mxu1 %v2447_v9  ;;  %2191 = vmatprep.subr.bf16.mxu0 %v2448_v10 }
  0x7e   : > { %2213 = vmatprep.subr.bf16.mxu1 %v2449_v11  ;;  %1677 = vmatprep.mubr.bf16.mxu0 %v378_v41  ;;  %v1745_v41 = vld [vmem:[%s2838_s3 + $0x20] sm:$0xff] (!%p2050_p7) }
  0x7f   : > { %1717 = vmatprep.mubr.bf16.mxu1 %v380_v46  ;;  %v1748_v46 = vld [vmem:[%s2838_s3 + $0x38] sm:$0xff] (!%p2050_p7) }
  0x80   : > { %2192 = vmatpush3.bf16.msra.mxu0 %v2450_v12 }
  0x81   : > { %2214 = vmatpush3.bf16.msra.mxu1 %v2451_v13  ;;  %2193 = vmatprep.subr.bf16.mxu0 %v2452_v14 }
  0x82   : > { %2215 = vmatprep.subr.bf16.mxu1 %v2453_v15 }
  0x84   : > { %2194 = vmatpush3.bf16.msra.mxu0 %v2454_v16 }
  0x85   : > { %2216 = vmatpush3.bf16.msra.mxu1 %v2455_v17  ;;  %2195 = vmatprep.subr.bf16.mxu0 %v2456_v18 }
  0x86   : > { %2217 = vmatprep.subr.bf16.mxu1 %v2457_v19 }
  0x88   : > { %2196 = vmatpush3.bf16.msra.mxu0 %v2458_v20 }
  0x89   : > { %2218 = vmatpush3.bf16.msra.mxu1 %v2459_v21  ;;  %2197 = vmatprep.subr.bf16.mxu0 %v2460_v22 }
  0x8a   : > { %2219 = vmatprep.subr.bf16.mxu1 %v2461_v23 }
  0x8c   : > { %2198 = vmatpush3.bf16.msra.mxu0 %v2462_v24 }
  0x8d   : > { %2220 = vmatpush3.bf16.msra.mxu1 %v2463_v25  ;;  %2199 = vmatprep.subr.bf16.mxu0 %v2464_v26 }
  0x8e   : > { %2221 = vmatprep.subr.bf16.mxu1 %v2465_v27 }
  0x90   : > { %2200 = vmatpush3.bf16.msra.mxu0 %v2466_v28 }
  0x91   : > { %2222 = vmatpush3.bf16.msra.mxu1 %v2467_v29  ;;  %2201 = vmatprep.subr.bf16.mxu0 %v2468_v30  ;;  %v272_v30 = vld [vmem:[#allocation2] sm:$0x3] }
  0x92   : > { %2223 = vmatprep.subr.bf16.mxu1 %v2469_v31 }
  0x94   : > { %2202 = vmatpush3.bf16.msra.mxu0 %v2470_v35  ;;  %v1743_v35 = vld [vmem:[%s2838_s3 + $0x10] sm:$0xff] (!%p2050_p7) }
  0x95   : > { %2224 = vmatpush3.bf16.msra.mxu1 %v2471_v36  ;;  %2203 = vmatprep.subr.bf16.mxu0 %v2472_v37  ;;  %v2533_v36 = vmov (!%p2050_p7), 0.0|0.0   ;;  %v2286_v37 = vpack.c.bf16 (!%p2050_p7), %v1742_v34, %v1741_v33 }
  0x96   : > { %2225 = vmatprep.subr.bf16.mxu1 %v2473_v38  ;;  %v1744_v38 = vld [vmem:[%s2838_s3 + $0x18] sm:$0xff] (!%p2050_p7) }
  0x97   : > { %v2289_v40 = vpack.c.bf16 (!%p2050_p7), %v1744_v38, %v1743_v35 }
  0x98   : > { %2204 = vmatpush3.bf16.msra.mxu0 %v2474_v44  ;;  %v2292_v44 = vpack.c.bf16 (!%p2050_p7), %v1746_v43, %v1745_v41 }
  0x99   : > { %2226 = vmatpush3.bf16.msra.mxu1 %v2475_v45  ;;  %2285 = vmatprep.subr.bf16.mxu0 (!%p2050_p7), %v2533_v36  ;;  %v1747_v45 = vld [vmem:[%s2838_s3 + $0x30] sm:$0xff] (!%p2050_p7) }
  0x9b   : > { %1678 = vmatmul.mubr.bf16.vlgmr.msra.gmra.mrb[12].mxu0 %v377_v47  ;;  %v2295_v47 = vpack.c.bf16 (!%p2050_p7), %v1748_v46, %v1747_v45 }
  0x9c   : > { %1718 = vmatmul.mubr.bf16.vlgmr.msra.gmra.mrb[12].mxu1 %v379_v48  ;;  %2282 = vmatprep.mubr.msk.f32.mxu0 (!%p2050_p7), %vm2534_vm0, %v2535_v39  ;;  %v1749_v48 = vld [vmem:[%s2838_s3 + $0x40] sm:$0xff] (!%p2050_p7) }
  0x9d   : > { %2287 = vmatpush3.bf16.msra.mxu0 (!%p2050_p7), %v2286_v37 }
  0x9e   : > { %2288 = vmatprep.subr.bf16.mxu0 (!%p2050_p7), %v2533_v36 }
  0xa1   : > { %2290 = vmatpush3.bf16.msra.mxu0 (!%p2050_p7), %v2289_v40 }
  0xa2   : > { %2291 = vmatprep.subr.bf16.mxu0 (!%p2050_p7), %v2533_v36 }
  0xa5   : > { %2293 = vmatpush3.bf16.msra.mxu0 (!%p2050_p7), %v2292_v44 }
  0xa6   : > { %2294 = vmatprep.subr.bf16.mxu0 (!%p2050_p7), %v2533_v36 }
  0xa9   : > { %2296 = vmatpush3.bf16.msra.mxu0 (!%p2050_p7), %v2295_v47 }
  0xaa   : > { %2297 = vmatprep.subr.bf16.mxu0 (!%p2050_p7), %v2533_v36 }
 0x10e   : > { %v2073_v49 = vpop.f32.mrb[0].mxu0 }
 0x10f   : > { %v2095_v50 = vpop.f32.mrb[0].mxu1  ;;  %v2074_v42 = vpop.f32.mrb[1].mxu0 }
 0x110   : > { %v2096_v51 = vpop.f32.mrb[1].mxu1  ;;  %v2075_v52 = vadd.f32 %v2074_v42, %v2073_v49  ;;  %v2076_v54 = vpop.f32.mrb[2].mxu0  ;;  %v1750_v49 = vld [vmem:[%s2838_s3 + $0x48] sm:$0xff] (!%p2050_p7)  ;;  %v1751_v42 = vld [vmem:[%s2838_s3 + $0x50] sm:$0xff] (!%p2050_p7) }
 0x111   : > { %v2097_v53 = vadd.f32 %v2096_v51, %v2095_v50  ;;  %v2098_v55 = vpop.f32.mrb[2].mxu1  ;;  %v2077_v56 = vpop.f32.mrb[3].mxu0  ;;  %v2298_v50 = vpack.c.bf16 (!%p2050_p7), %v1750_v49, %v1749_v48  ;;  %v1752_v51 = vld [vmem:[%s2838_s3 + $0x58] sm:$0xff] (!%p2050_p7)  ;;  %v1754_v54 = vld [vmem:[%s2838_s3 + $0x68] sm:$0xff] (!%p2050_p7) }
 0x112   : > { %v2099_v57 = vpop.f32.mrb[3].mxu1 }
 0x113   : > { %v1480_v58 = vadd.f32 %v2097_v53, %v2075_v52  ;;  %2299 = vmatpush3.bf16.msra.mxu0 (!%p2050_p7), %v2298_v50  ;;  %v2301_v52 = vpack.c.bf16 (!%p2050_p7), %v1752_v51, %v1751_v42  ;;  %v1753_v53 = vld [vmem:[%s2838_s3 + $0x60] sm:$0xff] (!%p2050_p7) }
 0x114   : > { %2300 = vmatprep.subr.bf16.mxu0 (!%p2050_p7), %v2533_v36  ;;  %v2304_v55 = vpack.c.bf16 (!%p2050_p7), %v1754_v54, %v1753_v53  ;;  %v2051_v57 = vld [vmem:[%s2837_s2] ss:$0 sm:$0xff] (!%p2050_p7) }
 0x117   : > { %2302 = vmatpush3.bf16.msra.mxu0 (!%p2050_p7), %v2301_v52 }
 0x118   : > { %2303 = vmatprep.subr.bf16.mxu0 (!%p2050_p7), %v2533_v36 }
 0x11b   : > { %2305 = vmatpush3.bf16.msra.mxu0 (!%p2050_p7), %v2304_v55 }
 0x11c   : > { %2306 = vmatprep.subr.bf16.mxu0 (!%p2050_p7), %v2533_v36 }
 0x12e   : > { %v2117_v59 = vpop.f32.mrb[4].mxu0 }
 0x12f   : > { %v2139_v60 = vpop.f32.mrb[4].mxu1  ;;  %v2118_v61 = vpop.f32.mrb[5].mxu0 }
 0x130   : > { %v2140_v62 = vpop.f32.mrb[5].mxu1  ;;  %v2119_v63 = vadd.f32 %v2118_v61, %v2117_v59  ;;  %v2120_v1 = vpop.f32.mrb[6].mxu0  ;;  %v1756_v59 = vld [vmem:[%s2838_s3 + $0x78] sm:$0xff] (!%p2050_p7) }
 0x131   : > { %v2141_v0 = vadd.f32 %v2140_v62, %v2139_v60  ;;  %v2142_v2 = vpop.f32.mrb[6].mxu1  ;;  %v2121_v3 = vpop.f32.mrb[7].mxu0 }
 0x132   : > { %v2143_v4 = vpop.f32.mrb[7].mxu1  ;;  %v1520_v5 = vadd.f32 %v2119_v63, %v1480_v58  ;;  %v1755_v58 = vld [vmem:[%s2838_s3 + $0x70] sm:$0xff] (!%p2050_p7)  ;;  %v2052_v63 = vld [vmem:[%s2839_s4] ss:$0 sm:$0xff] (!%p2050_p7) }
 0x133   : > { %v2307_v61 = vpack.c.bf16 (!%p2050_p7), %v1756_v59, %v1755_v58 }
 0x134   : > { %v1560_v6 = vadd.f32 %v2141_v0, %v1520_v5 }
 0x135   : > { %2308 = vmatpush3.bf16.msra.mxu0 (!%p2050_p7), %v2307_v61 }
 0x14e   : > { %v2161_v7 = vpop.f32.mrb[8].mxu0 }
 0x14f   : > { %v2183_v8 = vpop.f32.mrb[8].mxu1  ;;  %v2162_v9 = vpop.f32.mrb[9].mxu0 }
 0x150   : > { %v2184_v10 = vpop.f32.mrb[9].mxu1  ;;  %v2163_v11 = vadd.f32 %v2162_v9, %v2161_v7  ;;  %v2164_v13 = vpop.f32.mrb[10].mxu0 }
 0x151   : > { %v2185_v12 = vadd.f32 %v2184_v10, %v2183_v8  ;;  %v2186_v14 = vpop.f32.mrb[10].mxu1  ;;  %v2165_v15 = vpop.f32.mrb[11].mxu0 }
 0x152   : > { %v2187_v16 = vpop.f32.mrb[11].mxu1  ;;  %v1600_v17 = vadd.f32 %v2163_v11, %v1560_v6 }
 0x154   : > { %v1640_v18 = vadd.f32 %v2185_v12, %v1600_v17 }
 0x16e   : > { %v2205_v19 = vpop.f32.mrb[12].mxu0 }
 0x16f   : > { %v2227_v20 = vpop.f32.mrb[12].mxu1  ;;  %v2206_v21 = vpop.f32.mrb[13].mxu0 }
 0x170   : > { %v2228_v22 = vpop.f32.mrb[13].mxu1  ;;  %v2207_v23 = vadd.f32 %v2206_v21, %v2205_v19  ;;  %v2208_v25 = vpop.f32.mrb[14].mxu0 }
 0x171   : > { %v2229_v24 = vadd.f32 %v2228_v22, %v2227_v20  ;;  %v2230_v26 = vpop.f32.mrb[14].mxu1  ;;  %v2209_v27 = vpop.f32.mrb[15].mxu0 }
 0x172   : > { %v2231_v28 = vpop.f32.mrb[15].mxu1  ;;  %v1680_v29 = vadd.f32 %v2207_v23, %v1640_v18  ;;  %1730 = sbr.rel (%p2050_p7) target bundleno = 603 (0x25b), region = 48 }
 0x174   : > { %v1720_v31 = vadd.f32 %v2229_v24, %v1680_v29 }
 0x176   : > { %v1725_v32 = vadd.f32 %v1720_v31, %v272_v30 }
 0x178   : > { %1726 = vst [vmem:[#allocation2] sm:$0x3] %v1725_v32 }
 0x17f   : > { %v1731_v56 = vld [vmem:[#allocation2] sm:$0x3] }
 0x180   : > { %v1739_v60 = vadd.f32 %v2051_v57, %v1731_v56 }
 0x182   : > { %v1740_v62 = vmax.f32 %v1739_v60, 0.0 }
 0x184   : > { %2283 = vmatmul.mubr.f32.vlgmr.msra.gmra.mrb[0].mxu0 %v1740_v62 }
 0x257   : > { %v1830_v0 = vpop.f32.mrb[0].mxu0 }
 0x258   : > { %v1831_v1 = vadd.f32 %v2052_v63, %v1830_v0  ;;  %v2284_v2 = vpop.f32.mrb[1].mxu0 }
 0x25a   : > { %1835 = vst.msk [vmem:[#allocation3] sm:$0x3] %vm1834_vm1, %v1831_v1 }
 0x25b PF: > { %p2800_p8 = scmp.eq.s32.totalorder %s1913_s21, 3  ;;  %s2536_s28 = smov [#allocation3]  }
 0x25c   : > { %s1845_s29 = sshll.u32 %s2536_s28, 4  ;;  %s1846_s29 = int_to_ptr.vmem [resolvable:$true] %s1845_s29 }
 0x25d   : > { %s2477_s30 = scalar_lea.vmem %s1846_s29, 32  ;;  %p2484_p12 = scmp.lt.s32.totalorder %s1846_s29, %s1846_s29 }
 0x25e   : > { %p2478_p9 = scmp.ne.s32.totalorder %s1846_s29, %s2477_s30  ;;  %p2485_p13 = scmp.lt.s32.totalorder %s2477_s30, %s2477_s30 }
 0x260   : > { %p2479_p10 = pnand %p2478_p9, %p2800_p8  ;;  %p2486_p0 = por %p2485_p13, %p2484_p12 }
 0x262   : > { %p2480_p11 = pneg %p2479_p10 }
 0x264   : > { %p2487_p1 = pnand %p2486_p0, %p2480_p11 }
 0x266   : > { %2490 = shalt.err (!%p2487_p1)
}
 0x267   : > { %s2491_s21 = scalar_lea.hbm %s2840_s5, 32 }
 0x268   : > { %p2492_p2 = scmp.ne.s32.totalorder %s2840_s5, %s2491_s21  ;;  %p2497_p5 = scmp.lt.u32.totalorder %s2491_s21, %s2840_s5 }
 0x26a   : > { %p2493_p3 = pnand %p2492_p2, %p2800_p8 }
 0x26c   : > { %p2494_p4 = pneg %p2493_p3 }
 0x26e   : > { %p2499_p6 = pnand %p2497_p5, %p2494_p4 }
 0x270   : > { %2502 = shalt.err (!%p2499_p6)
}
 0x271   : > { %2310 = dma.vmem_to_hbm [thread:$0]  (%p2800_p8), %s1846_s29, 32, %s2840_s5, [#allocation4]  }
 0x272   : > { %2516 = dma.done.wait (%p2800_p8), [#allocation4], 32  }
 0x273   : > { %2518 = vsyncadd (%p2800_p8), [#allocation4], 4294967264 }
 0x274 PF: > { %s16_s20 = sadd.s32 1, %s2529_s20   ;;  %s2842_s18 = smov %s2525_s19 }
 0x275   : > { %p13_p7 = scmp.ge.s32.totalorder %s16_s20, 6   ;;  %s2843_s19 = smov %s2845_s22 }
 0x277   :  { %15 = sbr.rel (!%p13_p7) target bundleno = 2 (0x2), region = 79 }
 0x27e   :  { %1858 = vsyncpa [#allocation4], 1 }
 0x27f   :  { %1860 = vsyncpa [#allocation4 + $0x1], 1 }

</bundles_post_ra>
